<compile_context>
chip_gen: v7x
topology: tpu7x:2x2x1
jax: 0.10.0
libtpu: 0.0.40
codegen_flags: <defaults>
</compile_context>

<pallas_src>
import math

import jax
import jax.numpy as jnp
from jax import lax
from jax.experimental import pallas as pl
from jax.experimental.pallas import tpu as pltpu


# ----------------------------- in-kernel math -----------------------------

def _layernorm(x, gamma, beta, eps=1e-5):
    mu = jnp.mean(x, axis=-1, keepdims=True)
    var = jnp.mean((x - mu) ** 2, axis=-1, keepdims=True)
    return (x - mu) * lax.rsqrt(var + eps) * gamma + beta


def _new_gelu(x):
    # NewGELUActivation: 0.5*x*(1+tanh(sqrt(2/pi)*(x+0.044715*x^3)))
    c = math.sqrt(2.0 / math.pi)
    return 0.5 * x * (1.0 + jnp.tanh(c * (x + 0.044715 * x * x * x)))


def make_encoder_kernel(batch_block, seq_len, hidden, num_heads):
    Bblk, S, D, H = batch_block, seq_len, hidden, num_heads
    hd = D // H
    M = Bblk * S
    scale = 1.0 / math.sqrt(hd)

    def kernel(x_ref,
               ln1g_ref, ln1b_ref,
               wqkv_ref, bqkv_ref,
               wo_ref, bo_ref,
               ln2g_ref, ln2b_ref,
               w1_ref, b1_ref, w2_ref, b2_ref,
               o_ref):
        layer = pl.program_id(1)

        # Layer 0: load the input activation into the VMEM-resident output
        # block, which carries the residual stream across the layer grid axis.
        @pl.when(layer == 0)
        def _():
            o_ref[...] = x_ref[...]

        x = o_ref[...].reshape(M, D)                       # f32 residual stream

        # --- LayerNorm 1 (f32) + fused QKV projection (bf16 MXU, f32 acc) ---
        h = _layernorm(x, ln1g_ref[0], ln1b_ref[0])
        qkv = jnp.dot(h.astype(jnp.bfloat16), wqkv_ref[0],
                      preferred_element_type=jnp.float32) + bqkv_ref[0]  # (M, 3D)

        # --- Multi-head attention, batched over the batch block per head ---
        attn = jnp.zeros((M, D), jnp.float32)
        for hh in range(H):                                # static unroll over heads
            q_h = qkv[:, hh * hd:(hh + 1) * hd].reshape(Bblk, S, hd).astype(jnp.bfloat16)
            k_h = qkv[:, D + hh * hd:D + (hh + 1) * hd].reshape(Bblk, S, hd).astype(jnp.bfloat16)
            v_h = qkv[:, 2 * D + hh * hd:2 * D + (hh + 1) * hd].reshape(Bblk, S, hd).astype(jnp.bfloat16)

            s = jnp.einsum('bqd,bkd->bqk', q_h, k_h,
                           preferred_element_type=jnp.float32) * scale
            s = s - jnp.max(s, axis=-1, keepdims=True)
            e = jnp.exp(s)
            p = e * pl.reciprocal(jnp.sum(e, axis=-1, keepdims=True), approx=True)
            ctx = jnp.einsum('bqk,bkd->bqd', p.astype(jnp.bfloat16), v_h,
                             preferred_element_type=jnp.float32)         # (Bblk,S,hd)
            # Fold this head straight into the output projection with its own
            # Wo slice (avoids the per-head concatenate / lane relayout).
            attn = attn + jnp.dot(ctx.reshape(M, hd).astype(jnp.bfloat16),
                                  wo_ref[0, hh],
                                  preferred_element_type=jnp.float32)
        attn = attn + bo_ref[0]
        # attention / output dropouts are identity at inference

        x = x + attn                                       # residual 1 (f32)

        # --- LayerNorm 2 + MLP (tanh-GELU), bf16 matmuls / f32 elementwise ---
        h2 = _layernorm(x, ln2g_ref[0], ln2b_ref[0])
        m = jnp.dot(h2.astype(jnp.bfloat16), w1_ref[0],
                    preferred_element_type=jnp.float32) + b1_ref[0]
        m = _new_gelu(m)
        m = jnp.dot(m.astype(jnp.bfloat16), w2_ref[0],
                    preferred_element_type=jnp.float32) + b2_ref[0]

        o_ref[...] = (x + m).reshape(Bblk, S, D)           # residual 2

    return kernel


# ------------------------------- wrapper ----------------------------------

def encoder_forward(x, packed, num_heads, *, num_batch_blocks=None):
    """Whole Encoder in one pallas_call: grid = (batch_blocks, num_layers)."""
    B, S, D = x.shape
    L = packed["wqkv"].shape[0]

    if num_batch_blocks is None:
        # >=2 parallel steps keeps both v7x TensorCores busy; harmless on v5e/v6e.
        num_batch_blocks = 2 if (B % 2 == 0 and B >= 2) else 1
    assert B % num_batch_blocks == 0
    Bblk = B // num_batch_blocks

    kernel = make_encoder_kernel(Bblk, S, D, num_heads)

    def wspec(arr):
        shape = arr.shape
        n = len(shape)
        # one layer's slice per grid step; pipelined (next layer prefetched).
        return pl.BlockSpec((1,) + tuple(shape[1:]),
                            lambda b, l, _n=n: (l,) + (0,) * (_n - 1))

    in_specs = [
        pl.BlockSpec((Bblk, S, D), lambda b, l: (b, 0, 0)),   # x (one batch block)
        wspec(packed["ln1_g"]), wspec(packed["ln1_b"]),
        wspec(packed["wqkv"]), wspec(packed["bqkv"]),
        wspec(packed["wo"]),   wspec(packed["bo"]),
        wspec(packed["ln2_g"]), wspec(packed["ln2_b"]),
        wspec(packed["w1"]),   wspec(packed["b1"]),
        wspec(packed["w2"]),   wspec(packed["b2"]),
    ]
    out_spec = pl.BlockSpec((Bblk, S, D), lambda b, l: (b, 0, 0))

    return pl.pallas_call(
        kernel,
        out_shape=jax.ShapeDtypeStruct((B, S, D), jnp.float32),
        grid=(num_batch_blocks, L),
        in_specs=in_specs,
        out_specs=out_spec,
        compiler_params=pltpu.CompilerParams(
            dimension_semantics=("parallel", "arbitrary")),
    )(x,
      packed["ln1_g"], packed["ln1_b"],
      packed["wqkv"], packed["bqkv"],
      packed["wo"], packed["bo"],
      packed["ln2_g"], packed["ln2_b"],
      packed["w1"], packed["b1"], packed["w2"], packed["b2"])


# --------------------------- parameter packing ------------------------------

def init_layer_params(key, D, I):
    ks = jax.random.split(key, 8)
    s = 0.02
    return {
        "ln1_g": jnp.ones((1, D), jnp.float32),
        "ln1_b": jnp.zeros((1, D), jnp.float32),
        "wq": s * jax.random.normal(ks[0], (D, D), jnp.float32),
        "bq": s * jax.random.normal(ks[1], (1, D), jnp.float32),
        "wk": s * jax.random.normal(ks[2], (D, D), jnp.float32),
        "bk": jnp.zeros((1, D), jnp.float32),
        "wv": s * jax.random.normal(ks[3], (D, D), jnp.float32),
        "bv": jnp.zeros((1, D), jnp.float32),
        "wo": s * jax.random.normal(ks[4], (D, D), jnp.float32),
        "bo": jnp.zeros((1, D), jnp.float32),
        "ln2_g": jnp.ones((1, D), jnp.float32),
        "ln2_b": jnp.zeros((1, D), jnp.float32),
        "w1": s * jax.random.normal(ks[5], (D, I), jnp.float32),
        "b1": s * jax.random.normal(ks[6], (1, I), jnp.float32),
        "w2": s * jax.random.normal(ks[7], (I, D), jnp.float32),
        "b2": jnp.zeros((1, D), jnp.float32),
    }


def pack_params(layer_params, num_heads):
    """Stack per-layer params with a leading L axis; fuse QKV; bf16 weights."""
    D = layer_params[0]["wq"].shape[0]
    hd = D // num_heads

    def stack(name):
        return jnp.stack([p[name] for p in layer_params], axis=0)

    wqkv = jnp.stack([jnp.concatenate([p["wq"], p["wk"], p["wv"]], axis=1)
                      for p in layer_params], axis=0)          # (L, D, 3D)
    bqkv = jnp.stack([jnp.concatenate([p["bq"], p["bk"], p["bv"]], axis=1)
                      for p in layer_params], axis=0)          # (L, 1, 3D)
    wo_heads = jnp.stack([p["wo"].reshape(num_heads, hd, D)
                          for p in layer_params], axis=0)      # (L, H, hd, D)

    return {
        "ln1_g": stack("ln1_g"), "ln1_b": stack("ln1_b"),
        "wqkv": wqkv.astype(jnp.bfloat16), "bqkv": bqkv,
        "wo": wo_heads.astype(jnp.bfloat16), "bo": stack("bo"),
        "ln2_g": stack("ln2_g"), "ln2_b": stack("ln2_b"),
        "w1": stack("w1").astype(jnp.bfloat16), "b1": stack("b1"),
        "w2": stack("w2").astype(jnp.bfloat16), "b2": stack("b2"),
    }


# ---------------------------- pure-JAX reference ----------------------------

def _block_ref(x, p, num_heads):
    B, S, D = x.shape
    hd = D // num_heads
    h = _layernorm(x, p["ln1_g"][0], p["ln1_b"][0])
    q = h @ p["wq"] + p["bq"][0]
    k = h @ p["wk"] + p["bk"][0]
    v = h @ p["wv"] + p["bv"][0]
    q = q.reshape(B, S, num_heads, hd).transpose(0, 2, 1, 3)
    k = k.reshape(B, S, num_heads, hd).transpose(0, 2, 1, 3)
    v = v.reshape(B, S, num_heads, hd).transpose(0, 2, 1, 3)
    scores = jnp.einsum("bhqd,bhkd->bhqk", q, k) / math.sqrt(hd)
    probs = jax.nn.softmax(scores, axis=-1)
    ao = jnp.einsum("bhqk,bhkd->bhqd", probs, v).transpose(0, 2, 1, 3).reshape(B, S, D)
    ao = ao @ p["wo"] + p["bo"][0]
    x = x + ao
    h2 = _layernorm(x, p["ln2_g"][0], p["ln2_b"][0])
    m = _new_gelu(h2 @ p["w1"] + p["b1"][0]) @ p["w2"] + p["b2"][0]
    return x + m


def encoder_ref(x, layer_params, num_heads):
    for p in layer_params:
        x = _block_ref(x, p, num_heads)
    return x


# ---------------------------------- main ------------------------------------

if __name__ == "__main__":
    # config: hidden_size=32, num_attention_heads=4, intermediate_size=64,
    #         num_hidden_layers=2, qkv_bias=True, dropout probs -> identity.
    B, S, D, I, H, L = 2, 8, 32, 64, 4, 2

    key = jax.random.PRNGKey(0)
    key, xk = jax.random.split(key)
    x = jax.random.normal(xk, (B, S, D), jnp.float32)

    layer_keys = jax.random.split(key, L)
    layer_params = [init_layer_params(layer_keys[l], D, I) for l in range(L)]
    packed = pack_params(layer_params, H)

    out = encoder_forward(x, packed, H)
    out = jax.block_until_ready(out)

    ref = encoder_ref(x, layer_params, H)
    assert out.shape == (B, S, D)
    # bf16 matmul operands (f32 accumulation / elementwise) => relaxed tolerance
    # versus the pure-f32 reference.
    max_err = float(jnp.max(jnp.abs(out - ref)))
    assert jnp.allclose(out, ref, atol=2e-2, rtol=2e-2), f"mismatch vs reference (max err {max_err})"

    print("KERNEL_OK")
</pallas_src>

<mosaic_0001>
module attributes {stable_mosaic.version = 11 : i64} {
  func.func @kernel(%arg0: i32, %arg1: i32, %arg2: memref<1x8x32xf32, #tpu.memory_space<vmem>>, %arg3: memref<1x1x32xf32, #tpu.memory_space<vmem>>, %arg4: memref<1x1x32xf32, #tpu.memory_space<vmem>>, %arg5: memref<1x32x96xbf16, #tpu.memory_space<vmem>>, %arg6: memref<1x1x96xf32, #tpu.memory_space<vmem>>, %arg7: memref<1x4x8x32xbf16, #tpu.memory_space<vmem>>, %arg8: memref<1x1x32xf32, #tpu.memory_space<vmem>>, %arg9: memref<1x1x32xf32, #tpu.memory_space<vmem>>, %arg10: memref<1x1x32xf32, #tpu.memory_space<vmem>>, %arg11: memref<1x32x64xbf16, #tpu.memory_space<vmem>>, %arg12: memref<1x1x64xf32, #tpu.memory_space<vmem>>, %arg13: memref<1x64x32xbf16, #tpu.memory_space<vmem>>, %arg14: memref<1x1x32xf32, #tpu.memory_space<vmem>>, %arg15: memref<1x8x32xf32, #tpu.memory_space<vmem>>) attributes {dimension_semantics = [#tpu.dimension_semantics<parallel>, #tpu.dimension_semantics<arbitrary>], iteration_bounds = array<i64: 2, 2>, scalar_prefetch = 0 : i64, scratch_operands = 0 : i64, tpu.core_type = #tpu.core_type<tc>, window_params = [{transform_indices = @transform_0, window_bounds = array<i64: 1, 8, 32>}, {transform_indices = @transform_1, window_bounds = array<i64: 1, 1, 32>}, {transform_indices = @transform_2, window_bounds = array<i64: 1, 1, 32>}, {transform_indices = @transform_3, window_bounds = array<i64: 1, 32, 96>}, {transform_indices = @transform_4, window_bounds = array<i64: 1, 1, 96>}, {transform_indices = @transform_5, window_bounds = array<i64: 1, 4, 8, 32>}, {transform_indices = @transform_6, window_bounds = array<i64: 1, 1, 32>}, {transform_indices = @transform_7, window_bounds = array<i64: 1, 1, 32>}, {transform_indices = @transform_8, window_bounds = array<i64: 1, 1, 32>}, {transform_indices = @transform_9, window_bounds = array<i64: 1, 32, 64>}, {transform_indices = @transform_10, window_bounds = array<i64: 1, 1, 64>}, {transform_indices = @transform_11, window_bounds = array<i64: 1, 64, 32>}, {transform_indices = @transform_12, window_bounds = array<i64: 1, 1, 32>}, {transform_indices = @transform_13, window_bounds = array<i64: 1, 8, 32>}]} {
    %c0_i32 = arith.constant 0 : i32
    %0 = arith.cmpi eq, %arg1, %c0_i32 : i32
    %1 = arith.extui %0 : i1 to i32
    %c0_i32_0 = arith.constant 0 : i32
    %2 = arith.cmpi ne, %1, %c0_i32_0 : i32
    scf.if %2 {
      %c0_93 = arith.constant 0 : index
      %c0_94 = arith.constant 0 : index
      %c0_95 = arith.constant 0 : index
      %223 = vector.load %arg2[%c0_93, %c0_94, %c0_95] : memref<1x8x32xf32, #tpu.memory_space<vmem>>, vector<1x8x32xf32>
      %c0_96 = arith.constant 0 : index
      %c0_97 = arith.constant 0 : index
      %c0_98 = arith.constant 0 : index
      %224 = vector.load %arg15[%c0_96, %c0_97, %c0_98] : memref<1x8x32xf32, #tpu.memory_space<vmem>>, vector<1x8x32xf32>
      tpu.vector_store %arg15[%c0_96, %c0_97, %c0_98], %223 {strides = array<i32>} : memref<1x8x32xf32, #tpu.memory_space<vmem>>, vector<1x8x32xf32>,
    } else {
    }
    %c0 = arith.constant 0 : index
    %c0_1 = arith.constant 0 : index
    %c0_2 = arith.constant 0 : index
    %3 = vector.load %arg15[%c0, %c0_1, %c0_2] : memref<1x8x32xf32, #tpu.memory_space<vmem>>, vector<1x8x32xf32>
    %4 = vector.shape_cast %3 : vector<1x8x32xf32> to vector<8x32xf32>
    %c0_3 = arith.constant 0 : index
    %c0_4 = arith.constant 0 : index
    %c0_5 = arith.constant 0 : index
    %5 = vector.load %arg3[%c0_3, %c0_4, %c0_5] : memref<1x1x32xf32, #tpu.memory_space<vmem>>, vector<1x1x32xf32>
    %6 = vector.shape_cast %5 : vector<1x1x32xf32> to vector<1x32xf32>
    %c0_6 = arith.constant 0 : index
    %c0_7 = arith.constant 0 : index
    %c0_8 = arith.constant 0 : index
    %7 = vector.load %arg4[%c0_6, %c0_7, %c0_8] : memref<1x1x32xf32, #tpu.memory_space<vmem>>, vector<1x1x32xf32>
    %8 = vector.shape_cast %7 : vector<1x1x32xf32> to vector<1x32xf32>
    %cst = arith.constant dense<0.000000e+00> : vector<8xf32>
    %9 = vector.multi_reduction <add>, %4, %cst [1] : vector<8x32xf32> to vector<8xf32>
    %10 = vector.shape_cast %9 : vector<8xf32> to vector<8x1xf32>
    %cst_9 = arith.constant 3.200000e+01 : f32
    %11 = vector.broadcast %cst_9 : f32 to vector<8x1xf32>
    %12 = arith.divf %10, %11 : vector<8x1xf32>
    %13 = vector.broadcast %12 : vector<8x1xf32> to vector<8x32xf32>
    %14 = arith.subf %4, %13 : vector<8x32xf32>
    %15 = arith.mulf %14, %14 : vector<8x32xf32>
    %cst_10 = arith.constant dense<0.000000e+00> : vector<8xf32>
    %16 = vector.multi_reduction <add>, %15, %cst_10 [1] : vector<8x32xf32> to vector<8xf32>
    %17 = vector.shape_cast %16 : vector<8xf32> to vector<8x1xf32>
    %cst_11 = arith.constant 3.200000e+01 : f32
    %18 = vector.broadcast %cst_11 : f32 to vector<8x1xf32>
    %19 = arith.divf %17, %18 : vector<8x1xf32>
    %20 = vector.broadcast %12 : vector<8x1xf32> to vector<8x32xf32>
    %21 = arith.subf %4, %20 : vector<8x32xf32>
    %cst_12 = arith.constant 9.99999974E-6 : f32
    %22 = vector.broadcast %cst_12 : f32 to vector<8x1xf32>
    %23 = arith.addf %19, %22 : vector<8x1xf32>
    %24 = math.rsqrt %23 : vector<8x1xf32>
    %25 = vector.broadcast %24 : vector<8x1xf32> to vector<8x32xf32>
    %26 = arith.mulf %21, %25 : vector<8x32xf32>
    %27 = vector.broadcast %6 : vector<1x32xf32> to vector<8x32xf32>
    %28 = arith.mulf %26, %27 : vector<8x32xf32>
    %29 = vector.broadcast %8 : vector<1x32xf32> to vector<8x32xf32>
    %30 = arith.addf %28, %29 : vector<8x32xf32>
    %31 = arith.truncf %30 : vector<8x32xf32> to vector<8x32xbf16>
    %c0_13 = arith.constant 0 : index
    %c0_14 = arith.constant 0 : index
    %c0_15 = arith.constant 0 : index
    %32 = vector.load %arg5[%c0_13, %c0_14, %c0_15] : memref<1x32x96xbf16, #tpu.memory_space<vmem>>, vector<1x32x96xbf16>
    %33 = vector.shape_cast %32 : vector<1x32x96xbf16> to vector<32x96xbf16>
    %cst_16 = arith.constant dense<0.000000e+00> : vector<8x96xf32>
    %34 = tpu.matmul %31, %33, %cst_16 {dimension_numbers = #tpu.dot_dimension_numbers<[1], [0], [0], [1], [0, 0, 1, 1], [], []>} : vector<8x32xbf16>, vector<32x96xbf16>, vector<8x96xf32> -> vector<8x96xf32>
    %c0_17 = arith.constant 0 : index
    %c0_18 = arith.constant 0 : index
    %c0_19 = arith.constant 0 : index
    %35 = vector.load %arg6[%c0_17, %c0_18, %c0_19] : memref<1x1x96xf32, #tpu.memory_space<vmem>>, vector<1x1x96xf32>
    %36 = vector.shape_cast %35 : vector<1x1x96xf32> to vector<1x96xf32>
    %37 = vector.broadcast %36 : vector<1x96xf32> to vector<8x96xf32>
    %38 = arith.addf %34, %37 : vector<8x96xf32>
    %cst_20 = arith.constant 0.000000e+00 : f32
    %39 = vector.broadcast %cst_20 : f32 to vector<8x32xf32>
    %40 = vector.extract_strided_slice %38 {offsets = [0, 0], sizes = [8, 8], strides = [1, 1]} : vector<8x96xf32> to vector<8x8xf32>
    %41 = vector.shape_cast %40 : vector<8x8xf32> to vector<1x8x8xf32>
    %42 = arith.truncf %41 : vector<1x8x8xf32> to vector<1x8x8xbf16>
    %43 = vector.extract_strided_slice %38 {offsets = [0, 32], sizes = [8, 8], strides = [1, 1]} : vector<8x96xf32> to vector<8x8xf32>
    %44 = vector.shape_cast %43 : vector<8x8xf32> to vector<1x8x8xf32>
    %45 = arith.truncf %44 : vector<1x8x8xf32> to vector<1x8x8xbf16>
    %46 = vector.extract_strided_slice %38 {offsets = [0, 64], sizes = [8, 8], strides = [1, 1]} : vector<8x96xf32> to vector<8x8xf32>
    %47 = vector.shape_cast %46 : vector<8x8xf32> to vector<1x8x8xf32>
    %48 = arith.truncf %47 : vector<1x8x8xf32> to vector<1x8x8xbf16>
    "tpu.trace_start"() <{level = 10 : i32, message = "bqd,bkd->bqk"}> : () -> ()
    %cst_21 = arith.constant dense<0.000000e+00> : vector<1x8x8xf32>
    %49 = tpu.matmul %42, %45, %cst_21 {dimension_numbers = #tpu.dot_dimension_numbers<[2], [2], [1], [1], [0, 0, 0, 1, 1, 1], [0], [0]>} : vector<1x8x8xbf16>, vector<1x8x8xbf16>, vector<1x8x8xf32> -> vector<1x8x8xf32>
    "tpu.trace_stop"() : () -> ()
    %cst_22 = arith.constant 0.353553385 : f32
    %50 = vector.broadcast %cst_22 : f32 to vector<1x8x8xf32>
    %51 = arith.mulf %49, %50 : vector<1x8x8xf32>
    %cst_23 = arith.constant dense<0xFF800000> : vector<1x8xf32>
    %52 = vector.multi_reduction <maximumf>, %51, %cst_23 [2] : vector<1x8x8xf32> to vector<1x8xf32>
    %53 = vector.shape_cast %52 : vector<1x8xf32> to vector<1x8x1xf32>
    %54 = vector.broadcast %53 : vector<1x8x1xf32> to vector<1x8x8xf32>
    %55 = arith.subf %51, %54 : vector<1x8x8xf32>
    %56 = math.exp %55 : vector<1x8x8xf32>
    %cst_24 = arith.constant dense<0.000000e+00> : vector<1x8xf32>
    %57 = vector.multi_reduction <add>, %56, %cst_24 [2] : vector<1x8x8xf32> to vector<1x8xf32>
    %58 = vector.shape_cast %57 : vector<1x8xf32> to vector<1x8x1xf32>
    %59 = tpu.reciprocal %58 {approx = true} : vector<1x8x1xf32> -> vector<1x8x1xf32>
    %60 = vector.broadcast %59 : vector<1x8x1xf32> to vector<1x8x8xf32>
    %61 = arith.mulf %56, %60 : vector<1x8x8xf32>
    %62 = arith.truncf %61 : vector<1x8x8xf32> to vector<1x8x8xbf16>
    "tpu.trace_start"() <{level = 10 : i32, message = "bqk,bkd->bqd"}> : () -> ()
    %cst_25 = arith.constant dense<0.000000e+00> : vector<1x8x8xf32>
    %63 = tpu.matmul %62, %48, %cst_25 {dimension_numbers = #tpu.dot_dimension_numbers<[2], [1], [1], [2], [0, 0, 0, 1, 1, 2], [0], [0]>} : vector<1x8x8xbf16>, vector<1x8x8xbf16>, vector<1x8x8xf32> -> vector<1x8x8xf32>
    "tpu.trace_stop"() : () -> ()
    %64 = vector.shape_cast %63 : vector<1x8x8xf32> to vector<8x8xf32>
    %65 = arith.truncf %64 : vector<8x8xf32> to vector<8x8xbf16>
    %c0_26 = arith.constant 0 : index
    %c0_27 = arith.constant 0 : index
    %c0_28 = arith.constant 0 : index
    %c0_29 = arith.constant 0 : index
    %66 = vector.load %arg7[%c0_26, %c0_27, %c0_28, %c0_29] : memref<1x4x8x32xbf16, #tpu.memory_space<vmem>>, vector<1x1x8x32xbf16>
    %67 = vector.shape_cast %66 : vector<1x1x8x32xbf16> to vector<8x32xbf16>
    %cst_30 = arith.constant dense<0.000000e+00> : vector<8x32xf32>
    %68 = tpu.matmul %65, %67, %cst_30 {dimension_numbers = #tpu.dot_dimension_numbers<[1], [0], [0], [1], [0, 0, 1, 1], [], []>} : vector<8x8xbf16>, vector<8x32xbf16>, vector<8x32xf32> -> vector<8x32xf32>
    %69 = arith.addf %39, %68 : vector<8x32xf32>
    %70 = vector.extract_strided_slice %38 {offsets = [0, 8], sizes = [8, 8], strides = [1, 1]} : vector<8x96xf32> to vector<8x8xf32>
    %71 = vector.shape_cast %70 : vector<8x8xf32> to vector<1x8x8xf32>
    %72 = arith.truncf %71 : vector<1x8x8xf32> to vector<1x8x8xbf16>
    %73 = vector.extract_strided_slice %38 {offsets = [0, 40], sizes = [8, 8], strides = [1, 1]} : vector<8x96xf32> to vector<8x8xf32>
    %74 = vector.shape_cast %73 : vector<8x8xf32> to vector<1x8x8xf32>
    %75 = arith.truncf %74 : vector<1x8x8xf32> to vector<1x8x8xbf16>
    %76 = vector.extract_strided_slice %38 {offsets = [0, 72], sizes = [8, 8], strides = [1, 1]} : vector<8x96xf32> to vector<8x8xf32>
    %77 = vector.shape_cast %76 : vector<8x8xf32> to vector<1x8x8xf32>
    %78 = arith.truncf %77 : vector<1x8x8xf32> to vector<1x8x8xbf16>
    "tpu.trace_start"() <{level = 10 : i32, message = "bqd,bkd->bqk"}> : () -> ()
    %cst_31 = arith.constant dense<0.000000e+00> : vector<1x8x8xf32>
    %79 = tpu.matmul %72, %75, %cst_31 {dimension_numbers = #tpu.dot_dimension_numbers<[2], [2], [1], [1], [0, 0, 0, 1, 1, 1], [0], [0]>} : vector<1x8x8xbf16>, vector<1x8x8xbf16>, vector<1x8x8xf32> -> vector<1x8x8xf32>
    "tpu.trace_stop"() : () -> ()
    %cst_32 = arith.constant 0.353553385 : f32
    %80 = vector.broadcast %cst_32 : f32 to vector<1x8x8xf32>
    %81 = arith.mulf %79, %80 : vector<1x8x8xf32>
    %cst_33 = arith.constant dense<0xFF800000> : vector<1x8xf32>
    %82 = vector.multi_reduction <maximumf>, %81, %cst_33 [2] : vector<1x8x8xf32> to vector<1x8xf32>
    %83 = vector.shape_cast %82 : vector<1x8xf32> to vector<1x8x1xf32>
    %84 = vector.broadcast %83 : vector<1x8x1xf32> to vector<1x8x8xf32>
    %85 = arith.subf %81, %84 : vector<1x8x8xf32>
    %86 = math.exp %85 : vector<1x8x8xf32>
    %cst_34 = arith.constant dense<0.000000e+00> : vector<1x8xf32>
    %87 = vector.multi_reduction <add>, %86, %cst_34 [2] : vector<1x8x8xf32> to vector<1x8xf32>
    %88 = vector.shape_cast %87 : vector<1x8xf32> to vector<1x8x1xf32>
    %89 = tpu.reciprocal %88 {approx = true} : vector<1x8x1xf32> -> vector<1x8x1xf32>
    %90 = vector.broadcast %89 : vector<1x8x1xf32> to vector<1x8x8xf32>
    %91 = arith.mulf %86, %90 : vector<1x8x8xf32>
    %92 = arith.truncf %91 : vector<1x8x8xf32> to vector<1x8x8xbf16>
    "tpu.trace_start"() <{level = 10 : i32, message = "bqk,bkd->bqd"}> : () -> ()
    %cst_35 = arith.constant dense<0.000000e+00> : vector<1x8x8xf32>
    %93 = tpu.matmul %92, %78, %cst_35 {dimension_numbers = #tpu.dot_dimension_numbers<[2], [1], [1], [2], [0, 0, 0, 1, 1, 2], [0], [0]>} : vector<1x8x8xbf16>, vector<1x8x8xbf16>, vector<1x8x8xf32> -> vector<1x8x8xf32>
    "tpu.trace_stop"() : () -> ()
    %94 = vector.shape_cast %93 : vector<1x8x8xf32> to vector<8x8xf32>
    %95 = arith.truncf %94 : vector<8x8xf32> to vector<8x8xbf16>
    %c0_36 = arith.constant 0 : index
    %c1 = arith.constant 1 : index
    %c0_37 = arith.constant 0 : index
    %c0_38 = arith.constant 0 : index
    %96 = vector.load %arg7[%c0_36, %c1, %c0_37, %c0_38] : memref<1x4x8x32xbf16, #tpu.memory_space<vmem>>, vector<1x1x8x32xbf16>
    %97 = vector.shape_cast %96 : vector<1x1x8x32xbf16> to vector<8x32xbf16>
    %cst_39 = arith.constant dense<0.000000e+00> : vector<8x32xf32>
    %98 = tpu.matmul %95, %97, %cst_39 {dimension_numbers = #tpu.dot_dimension_numbers<[1], [0], [0], [1], [0, 0, 1, 1], [], []>} : vector<8x8xbf16>, vector<8x32xbf16>, vector<8x32xf32> -> vector<8x32xf32>
    %99 = arith.addf %69, %98 : vector<8x32xf32>
    %100 = vector.extract_strided_slice %38 {offsets = [0, 16], sizes = [8, 8], strides = [1, 1]} : vector<8x96xf32> to vector<8x8xf32>
    %101 = vector.shape_cast %100 : vector<8x8xf32> to vector<1x8x8xf32>
    %102 = arith.truncf %101 : vector<1x8x8xf32> to vector<1x8x8xbf16>
    %103 = vector.extract_strided_slice %38 {offsets = [0, 48], sizes = [8, 8], strides = [1, 1]} : vector<8x96xf32> to vector<8x8xf32>
    %104 = vector.shape_cast %103 : vector<8x8xf32> to vector<1x8x8xf32>
    %105 = arith.truncf %104 : vector<1x8x8xf32> to vector<1x8x8xbf16>
    %106 = vector.extract_strided_slice %38 {offsets = [0, 80], sizes = [8, 8], strides = [1, 1]} : vector<8x96xf32> to vector<8x8xf32>
    %107 = vector.shape_cast %106 : vector<8x8xf32> to vector<1x8x8xf32>
    %108 = arith.truncf %107 : vector<1x8x8xf32> to vector<1x8x8xbf16>
    "tpu.trace_start"() <{level = 10 : i32, message = "bqd,bkd->bqk"}> : () -> ()
    %cst_40 = arith.constant dense<0.000000e+00> : vector<1x8x8xf32>
    %109 = tpu.matmul %102, %105, %cst_40 {dimension_numbers = #tpu.dot_dimension_numbers<[2], [2], [1], [1], [0, 0, 0, 1, 1, 1], [0], [0]>} : vector<1x8x8xbf16>, vector<1x8x8xbf16>, vector<1x8x8xf32> -> vector<1x8x8xf32>
    "tpu.trace_stop"() : () -> ()
    %cst_41 = arith.constant 0.353553385 : f32
    %110 = vector.broadcast %cst_41 : f32 to vector<1x8x8xf32>
    %111 = arith.mulf %109, %110 : vector<1x8x8xf32>
    %cst_42 = arith.constant dense<0xFF800000> : vector<1x8xf32>
    %112 = vector.multi_reduction <maximumf>, %111, %cst_42 [2] : vector<1x8x8xf32> to vector<1x8xf32>
    %113 = vector.shape_cast %112 : vector<1x8xf32> to vector<1x8x1xf32>
    %114 = vector.broadcast %113 : vector<1x8x1xf32> to vector<1x8x8xf32>
    %115 = arith.subf %111, %114 : vector<1x8x8xf32>
    %116 = math.exp %115 : vector<1x8x8xf32>
    %cst_43 = arith.constant dense<0.000000e+00> : vector<1x8xf32>
    %117 = vector.multi_reduction <add>, %116, %cst_43 [2] : vector<1x8x8xf32> to vector<1x8xf32>
    %118 = vector.shape_cast %117 : vector<1x8xf32> to vector<1x8x1xf32>
    %119 = tpu.reciprocal %118 {approx = true} : vector<1x8x1xf32> -> vector<1x8x1xf32>
    %120 = vector.broadcast %119 : vector<1x8x1xf32> to vector<1x8x8xf32>
    %121 = arith.mulf %116, %120 : vector<1x8x8xf32>
    %122 = arith.truncf %121 : vector<1x8x8xf32> to vector<1x8x8xbf16>
    "tpu.trace_start"() <{level = 10 : i32, message = "bqk,bkd->bqd"}> : () -> ()
    %cst_44 = arith.constant dense<0.000000e+00> : vector<1x8x8xf32>
    %123 = tpu.matmul %122, %108, %cst_44 {dimension_numbers = #tpu.dot_dimension_numbers<[2], [1], [1], [2], [0, 0, 0, 1, 1, 2], [0], [0]>} : vector<1x8x8xbf16>, vector<1x8x8xbf16>, vector<1x8x8xf32> -> vector<1x8x8xf32>
    "tpu.trace_stop"() : () -> ()
    %124 = vector.shape_cast %123 : vector<1x8x8xf32> to vector<8x8xf32>
    %125 = arith.truncf %124 : vector<8x8xf32> to vector<8x8xbf16>
    %c0_45 = arith.constant 0 : index
    %c2 = arith.constant 2 : index
    %c0_46 = arith.constant 0 : index
    %c0_47 = arith.constant 0 : index
    %126 = vector.load %arg7[%c0_45, %c2, %c0_46, %c0_47] : memref<1x4x8x32xbf16, #tpu.memory_space<vmem>>, vector<1x1x8x32xbf16>
    %127 = vector.shape_cast %126 : vector<1x1x8x32xbf16> to vector<8x32xbf16>
    %cst_48 = arith.constant dense<0.000000e+00> : vector<8x32xf32>
    %128 = tpu.matmul %125, %127, %cst_48 {dimension_numbers = #tpu.dot_dimension_numbers<[1], [0], [0], [1], [0, 0, 1, 1], [], []>} : vector<8x8xbf16>, vector<8x32xbf16>, vector<8x32xf32> -> vector<8x32xf32>
    %129 = arith.addf %99, %128 : vector<8x32xf32>
    %130 = vector.extract_strided_slice %38 {offsets = [0, 24], sizes = [8, 8], strides = [1, 1]} : vector<8x96xf32> to vector<8x8xf32>
    %131 = vector.shape_cast %130 : vector<8x8xf32> to vector<1x8x8xf32>
    %132 = arith.truncf %131 : vector<1x8x8xf32> to vector<1x8x8xbf16>
    %133 = vector.extract_strided_slice %38 {offsets = [0, 56], sizes = [8, 8], strides = [1, 1]} : vector<8x96xf32> to vector<8x8xf32>
    %134 = vector.shape_cast %133 : vector<8x8xf32> to vector<1x8x8xf32>
    %135 = arith.truncf %134 : vector<1x8x8xf32> to vector<1x8x8xbf16>
    %136 = vector.extract_strided_slice %38 {offsets = [0, 88], sizes = [8, 8], strides = [1, 1]} : vector<8x96xf32> to vector<8x8xf32>
    %137 = vector.shape_cast %136 : vector<8x8xf32> to vector<1x8x8xf32>
    %138 = arith.truncf %137 : vector<1x8x8xf32> to vector<1x8x8xbf16>
    "tpu.trace_start"() <{level = 10 : i32, message = "bqd,bkd->bqk"}> : () -> ()
    %cst_49 = arith.constant dense<0.000000e+00> : vector<1x8x8xf32>
    %139 = tpu.matmul %132, %135, %cst_49 {dimension_numbers = #tpu.dot_dimension_numbers<[2], [2], [1], [1], [0, 0, 0, 1, 1, 1], [0], [0]>} : vector<1x8x8xbf16>, vector<1x8x8xbf16>, vector<1x8x8xf32> -> vector<1x8x8xf32>
    "tpu.trace_stop"() : () -> ()
    %cst_50 = arith.constant 0.353553385 : f32
    %140 = vector.broadcast %cst_50 : f32 to vector<1x8x8xf32>
    %141 = arith.mulf %139, %140 : vector<1x8x8xf32>
    %cst_51 = arith.constant dense<0xFF800000> : vector<1x8xf32>
    %142 = vector.multi_reduction <maximumf>, %141, %cst_51 [2] : vector<1x8x8xf32> to vector<1x8xf32>
    %143 = vector.shape_cast %142 : vector<1x8xf32> to vector<1x8x1xf32>
    %144 = vector.broadcast %143 : vector<1x8x1xf32> to vector<1x8x8xf32>
    %145 = arith.subf %141, %144 : vector<1x8x8xf32>
    %146 = math.exp %145 : vector<1x8x8xf32>
    %cst_52 = arith.constant dense<0.000000e+00> : vector<1x8xf32>
    %147 = vector.multi_reduction <add>, %146, %cst_52 [2] : vector<1x8x8xf32> to vector<1x8xf32>
    %148 = vector.shape_cast %147 : vector<1x8xf32> to vector<1x8x1xf32>
    %149 = tpu.reciprocal %148 {approx = true} : vector<1x8x1xf32> -> vector<1x8x1xf32>
    %150 = vector.broadcast %149 : vector<1x8x1xf32> to vector<1x8x8xf32>
    %151 = arith.mulf %146, %150 : vector<1x8x8xf32>
    %152 = arith.truncf %151 : vector<1x8x8xf32> to vector<1x8x8xbf16>
    "tpu.trace_start"() <{level = 10 : i32, message = "bqk,bkd->bqd"}> : () -> ()
    %cst_53 = arith.constant dense<0.000000e+00> : vector<1x8x8xf32>
    %153 = tpu.matmul %152, %138, %cst_53 {dimension_numbers = #tpu.dot_dimension_numbers<[2], [1], [1], [2], [0, 0, 0, 1, 1, 2], [0], [0]>} : vector<1x8x8xbf16>, vector<1x8x8xbf16>, vector<1x8x8xf32> -> vector<1x8x8xf32>
    "tpu.trace_stop"() : () -> ()
    %154 = vector.shape_cast %153 : vector<1x8x8xf32> to vector<8x8xf32>
    %155 = arith.truncf %154 : vector<8x8xf32> to vector<8x8xbf16>
    %c0_54 = arith.constant 0 : index
    %c3 = arith.constant 3 : index
    %c0_55 = arith.constant 0 : index
    %c0_56 = arith.constant 0 : index
    %156 = vector.load %arg7[%c0_54, %c3, %c0_55, %c0_56] : memref<1x4x8x32xbf16, #tpu.memory_space<vmem>>, vector<1x1x8x32xbf16>
    %157 = vector.shape_cast %156 : vector<1x1x8x32xbf16> to vector<8x32xbf16>
    %cst_57 = arith.constant dense<0.000000e+00> : vector<8x32xf32>
    %158 = tpu.matmul %155, %157, %cst_57 {dimension_numbers = #tpu.dot_dimension_numbers<[1], [0], [0], [1], [0, 0, 1, 1], [], []>} : vector<8x8xbf16>, vector<8x32xbf16>, vector<8x32xf32> -> vector<8x32xf32>
    %159 = arith.addf %129, %158 : vector<8x32xf32>
    %c0_58 = arith.constant 0 : index
    %c0_59 = arith.constant 0 : index
    %c0_60 = arith.constant 0 : index
    %160 = vector.load %arg8[%c0_58, %c0_59, %c0_60] : memref<1x1x32xf32, #tpu.memory_space<vmem>>, vector<1x1x32xf32>
    %161 = vector.shape_cast %160 : vector<1x1x32xf32> to vector<1x32xf32>
    %162 = vector.broadcast %161 : vector<1x32xf32> to vector<8x32xf32>
    %163 = arith.addf %159, %162 : vector<8x32xf32>
    %164 = arith.addf %4, %163 : vector<8x32xf32>
    %c0_61 = arith.constant 0 : index
    %c0_62 = arith.constant 0 : index
    %c0_63 = arith.constant 0 : index
    %165 = vector.load %arg9[%c0_61, %c0_62, %c0_63] : memref<1x1x32xf32, #tpu.memory_space<vmem>>, vector<1x1x32xf32>
    %166 = vector.shape_cast %165 : vector<1x1x32xf32> to vector<1x32xf32>
    %c0_64 = arith.constant 0 : index
    %c0_65 = arith.constant 0 : index
    %c0_66 = arith.constant 0 : index
    %167 = vector.load %arg10[%c0_64, %c0_65, %c0_66] : memref<1x1x32xf32, #tpu.memory_space<vmem>>, vector<1x1x32xf32>
    %168 = vector.shape_cast %167 : vector<1x1x32xf32> to vector<1x32xf32>
    %cst_67 = arith.constant dense<0.000000e+00> : vector<8xf32>
    %169 = vector.multi_reduction <add>, %164, %cst_67 [1] : vector<8x32xf32> to vector<8xf32>
    %170 = vector.shape_cast %169 : vector<8xf32> to vector<8x1xf32>
    %cst_68 = arith.constant 3.200000e+01 : f32
    %171 = vector.broadcast %cst_68 : f32 to vector<8x1xf32>
    %172 = arith.divf %170, %171 : vector<8x1xf32>
    %173 = vector.broadcast %172 : vector<8x1xf32> to vector<8x32xf32>
    %174 = arith.subf %164, %173 : vector<8x32xf32>
    %175 = arith.mulf %174, %174 : vector<8x32xf32>
    %cst_69 = arith.constant dense<0.000000e+00> : vector<8xf32>
    %176 = vector.multi_reduction <add>, %175, %cst_69 [1] : vector<8x32xf32> to vector<8xf32>
    %177 = vector.shape_cast %176 : vector<8xf32> to vector<8x1xf32>
    %cst_70 = arith.constant 3.200000e+01 : f32
    %178 = vector.broadcast %cst_70 : f32 to vector<8x1xf32>
    %179 = arith.divf %177, %178 : vector<8x1xf32>
    %180 = vector.broadcast %172 : vector<8x1xf32> to vector<8x32xf32>
    %181 = arith.subf %164, %180 : vector<8x32xf32>
    %cst_71 = arith.constant 9.99999974E-6 : f32
    %182 = vector.broadcast %cst_71 : f32 to vector<8x1xf32>
    %183 = arith.addf %179, %182 : vector<8x1xf32>
    %184 = math.rsqrt %183 : vector<8x1xf32>
    %185 = vector.broadcast %184 : vector<8x1xf32> to vector<8x32xf32>
    %186 = arith.mulf %181, %185 : vector<8x32xf32>
    %187 = vector.broadcast %166 : vector<1x32xf32> to vector<8x32xf32>
    %188 = arith.mulf %186, %187 : vector<8x32xf32>
    %189 = vector.broadcast %168 : vector<1x32xf32> to vector<8x32xf32>
    %190 = arith.addf %188, %189 : vector<8x32xf32>
    %191 = arith.truncf %190 : vector<8x32xf32> to vector<8x32xbf16>
    %c0_72 = arith.constant 0 : index
    %c0_73 = arith.constant 0 : index
    %c0_74 = arith.constant 0 : index
    %192 = vector.load %arg11[%c0_72, %c0_73, %c0_74] : memref<1x32x64xbf16, #tpu.memory_space<vmem>>, vector<1x32x64xbf16>
    %193 = vector.shape_cast %192 : vector<1x32x64xbf16> to vector<32x64xbf16>
    %cst_75 = arith.constant dense<0.000000e+00> : vector<8x64xf32>
    %194 = tpu.matmul %191, %193, %cst_75 {dimension_numbers = #tpu.dot_dimension_numbers<[1], [0], [0], [1], [0, 0, 1, 1], [], []>} : vector<8x32xbf16>, vector<32x64xbf16>, vector<8x64xf32> -> vector<8x64xf32>
    %c0_76 = arith.constant 0 : index
    %c0_77 = arith.constant 0 : index
    %c0_78 = arith.constant 0 : index
    %195 = vector.load %arg12[%c0_76, %c0_77, %c0_78] : memref<1x1x64xf32, #tpu.memory_space<vmem>>, vector<1x1x64xf32>
    %196 = vector.shape_cast %195 : vector<1x1x64xf32> to vector<1x64xf32>
    %197 = vector.broadcast %196 : vector<1x64xf32> to vector<8x64xf32>
    %198 = arith.addf %194, %197 : vector<8x64xf32>
    %cst_79 = arith.constant 5.000000e-01 : f32
    %199 = vector.broadcast %cst_79 : f32 to vector<8x64xf32>
    %200 = arith.mulf %199, %198 : vector<8x64xf32>
    %cst_80 = arith.constant 4.471500e-02 : f32
    %201 = vector.broadcast %cst_80 : f32 to vector<8x64xf32>
    %202 = arith.mulf %201, %198 : vector<8x64xf32>
    %203 = arith.mulf %202, %198 : vector<8x64xf32>
    %204 = arith.mulf %203, %198 : vector<8x64xf32>
    %205 = arith.addf %198, %204 : vector<8x64xf32>
    %cst_81 = arith.constant 0.797884583 : f32
    %206 = vector.broadcast %cst_81 : f32 to vector<8x64xf32>
    %207 = arith.mulf %206, %205 : vector<8x64xf32>
    %208 = math.tanh %207 : vector<8x64xf32>
    %cst_82 = arith.constant 1.000000e+00 : f32
    %209 = vector.broadcast %cst_82 : f32 to vector<8x64xf32>
    %210 = arith.addf %209, %208 : vector<8x64xf32>
    %211 = arith.mulf %200, %210 : vector<8x64xf32>
    %212 = arith.truncf %211 : vector<8x64xf32> to vector<8x64xbf16>
    %c0_83 = arith.constant 0 : index
    %c0_84 = arith.constant 0 : index
    %c0_85 = arith.constant 0 : index
    %213 = vector.load %arg13[%c0_83, %c0_84, %c0_85] : memref<1x64x32xbf16, #tpu.memory_space<vmem>>, vector<1x64x32xbf16>
    %214 = vector.shape_cast %213 : vector<1x64x32xbf16> to vector<64x32xbf16>
    %cst_86 = arith.constant dense<0.000000e+00> : vector<8x32xf32>
    %215 = tpu.matmul %212, %214, %cst_86 {dimension_numbers = #tpu.dot_dimension_numbers<[1], [0], [0], [1], [0, 0, 1, 1], [], []>} : vector<8x64xbf16>, vector<64x32xbf16>, vector<8x32xf32> -> vector<8x32xf32>
    %c0_87 = arith.constant 0 : index
    %c0_88 = arith.constant 0 : index
    %c0_89 = arith.constant 0 : index
    %216 = vector.load %arg14[%c0_87, %c0_88, %c0_89] : memref<1x1x32xf32, #tpu.memory_space<vmem>>, vector<1x1x32xf32>
    %217 = vector.shape_cast %216 : vector<1x1x32xf32> to vector<1x32xf32>
    %218 = vector.broadcast %217 : vector<1x32xf32> to vector<8x32xf32>
    %219 = arith.addf %215, %218 : vector<8x32xf32>
    %220 = arith.addf %164, %219 : vector<8x32xf32>
    %221 = vector.shape_cast %220 : vector<8x32xf32> to vector<1x8x32xf32>
    %c0_90 = arith.constant 0 : index
    %c0_91 = arith.constant 0 : index
    %c0_92 = arith.constant 0 : index
    %222 = vector.load %arg15[%c0_90, %c0_91, %c0_92] : memref<1x8x32xf32, #tpu.memory_space<vmem>>, vector<1x8x32xf32>
    tpu.vector_store %arg15[%c0_90, %c0_91, %c0_92], %221 {strides = array<i32>} : memref<1x8x32xf32, #tpu.memory_space<vmem>>, vector<1x8x32xf32>,
    return
  }
  func.func @transform_0(%arg0: i32, %arg1: i32) -> (i32, i32, i32) {
    %c0_i32 = arith.constant 0 : i32
    %c0_i32_0 = arith.constant 0 : i32
    %c0_i32_1 = arith.constant 0 : i32
    return %arg0, %c0_i32, %c0_i32_0 : i32, i32, i32
  }
  func.func @transform_1(%arg0: i32, %arg1: i32) -> (i32, i32, i32) {
    %c0_i32 = arith.constant 0 : i32
    %c0_i32_0 = arith.constant 0 : i32
    %c0_i32_1 = arith.constant 0 : i32
    return %arg1, %c0_i32, %c0_i32_0 : i32, i32, i32
  }
  func.func @transform_2(%arg0: i32, %arg1: i32) -> (i32, i32, i32) {
    %c0_i32 = arith.constant 0 : i32
    %c0_i32_0 = arith.constant 0 : i32
    %c0_i32_1 = arith.constant 0 : i32
    return %arg1, %c0_i32, %c0_i32_0 : i32, i32, i32
  }
  func.func @transform_3(%arg0: i32, %arg1: i32) -> (i32, i32, i32) {
    %c0_i32 = arith.constant 0 : i32
    %c0_i32_0 = arith.constant 0 : i32
    %c0_i32_1 = arith.constant 0 : i32
    return %arg1, %c0_i32, %c0_i32_0 : i32, i32, i32
  }
  func.func @transform_4(%arg0: i32, %arg1: i32) -> (i32, i32, i32) {
    %c0_i32 = arith.constant 0 : i32
    %c0_i32_0 = arith.constant 0 : i32
    %c0_i32_1 = arith.constant 0 : i32
    return %arg1, %c0_i32, %c0_i32_0 : i32, i32, i32
  }
  func.func @transform_5(%arg0: i32, %arg1: i32) -> (i32, i32, i32, i32) {
    %c0_i32 = arith.constant 0 : i32
    %c0_i32_0 = arith.constant 0 : i32
    %c0_i32_1 = arith.constant 0 : i32
    %c0_i32_2 = arith.constant 0 : i32
    return %arg1, %c0_i32, %c0_i32_0, %c0_i32_1 : i32, i32, i32, i32
  }
  func.func @transform_6(%arg0: i32, %arg1: i32) -> (i32, i32, i32) {
    %c0_i32 = arith.constant 0 : i32
    %c0_i32_0 = arith.constant 0 : i32
    %c0_i32_1 = arith.constant 0 : i32
    return %arg1, %c0_i32, %c0_i32_0 : i32, i32, i32
  }
  func.func @transform_7(%arg0: i32, %arg1: i32) -> (i32, i32, i32) {
    %c0_i32 = arith.constant 0 : i32
    %c0_i32_0 = arith.constant 0 : i32
    %c0_i32_1 = arith.constant 0 : i32
    return %arg1, %c0_i32, %c0_i32_0 : i32, i32, i32
  }
  func.func @transform_8(%arg0: i32, %arg1: i32) -> (i32, i32, i32) {
    %c0_i32 = arith.constant 0 : i32
    %c0_i32_0 = arith.constant 0 : i32
    %c0_i32_1 = arith.constant 0 : i32
    return %arg1, %c0_i32, %c0_i32_0 : i32, i32, i32
  }
  func.func @transform_9(%arg0: i32, %arg1: i32) -> (i32, i32, i32) {
    %c0_i32 = arith.constant 0 : i32
    %c0_i32_0 = arith.constant 0 : i32
    %c0_i32_1 = arith.constant 0 : i32
    return %arg1, %c0_i32, %c0_i32_0 : i32, i32, i32
  }
  func.func @transform_10(%arg0: i32, %arg1: i32) -> (i32, i32, i32) {
    %c0_i32 = arith.constant 0 : i32
    %c0_i32_0 = arith.constant 0 : i32
    %c0_i32_1 = arith.constant 0 : i32
    return %arg1, %c0_i32, %c0_i32_0 : i32, i32, i32
  }
  func.func @transform_11(%arg0: i32, %arg1: i32) -> (i32, i32, i32) {
    %c0_i32 = arith.constant 0 : i32
    %c0_i32_0 = arith.constant 0 : i32
    %c0_i32_1 = arith.constant 0 : i32
    return %arg1, %c0_i32, %c0_i32_0 : i32, i32, i32
  }
  func.func @transform_12(%arg0: i32, %arg1: i32) -> (i32, i32, i32) {
    %c0_i32 = arith.constant 0 : i32
    %c0_i32_0 = arith.constant 0 : i32
    %c0_i32_1 = arith.constant 0 : i32
    return %arg1, %c0_i32, %c0_i32_0 : i32, i32, i32
  }
  func.func @transform_13(%arg0: i32, %arg1: i32) -> (i32, i32, i32) {
    %c0_i32 = arith.constant 0 : i32
    %c0_i32_0 = arith.constant 0 : i32
    %c0_i32_1 = arith.constant 0 : i32
    return %arg0, %c0_i32, %c0_i32_0 : i32, i32, i32
  }
}

</mosaic_0001>

<bundles_post_ra>
// kernel: tpu_custom_call.1
= control target key start
LH: loop header
LB: loop body
LE: loop exit
PB: predicated region body
PF: predicated region fallthrough
CT: control target
= control target key end

     0   :  { %s3196_s0 = inlined_call_operand.hbm [shape: f32[2,8,32], index: 0, kind: input, shape index: {}]   ;;  %s3197_s1 = inlined_call_operand.vmem [shape: f32[2,1,32], index: 1, kind: input, shape index: {}]   ;;  %s3198_s2 = inlined_call_operand.vmem [shape: f32[2,1,32], index: 2, kind: input, shape index: {}]   ;;  %s3199_s3 = inlined_call_operand.vmem [shape: bf16[2,32,96], index: 3, kind: input, shape index: {}]   ;;  %s3200_s4 = inlined_call_operand.vmem [shape: f32[2,1,96], index: 4, kind: input, shape index: {}]   ;;  %s3201_s5 = inlined_call_operand.vmem [shape: bf16[2,4,8,32], index: 5, kind: input, shape index: {}]   ;;  %s3202_s6 = inlined_call_operand.vmem [shape: f32[2,1,32], index: 6, kind: input, shape index: {}]   ;;  %s3203_s7 = inlined_call_operand.hbm [shape: f32[2,1,32], index: 7, kind: input, shape index: {}]   ;;  %s3204_s8 = inlined_call_operand.hbm [shape: f32[2,1,32], index: 8, kind: input, shape index: {}]   ;;  %s3205_s9 = inlined_call_operand.vmem [shape: bf16[2,32,64], index: 9, kind: input, shape index: {}]   ;;  %s3206_s10 = inlined_call_operand.hbm [shape: f32[2,1,64], index: 10, kind: input, shape index: {}]   ;;  %s3207_s11 = inlined_call_operand.vmem [shape: bf16[2,64,32], index: 11, kind: input, shape index: {}]   ;;  %s3208_s12 = inlined_call_operand.vmem [shape: f32[2,1,32], index: 12, kind: input, shape index: {}]   ;;  %s3209_s13 = inlined_call_operand.hbm [shape: f32[2,8,32], index: 13, kind: output, shape index: {}]  }
   0x1   :  { %3230 = sst [smem:[#allocation27_spill]] %s3196_s0 }
   0x2   :  { %3231 = sst [smem:[#allocation28_spill]] %s3197_s1 }
   0x3   :  { %3232 = sst [smem:[#allocation29_spill]] %s3198_s2 }
   0x4   :  { %3233 = sst [smem:[#allocation30_spill]] %s3199_s3 }
   0x5   :  { %3234 = sst [smem:[#allocation31_spill]] %s3200_s4 }
   0x6   :  { %3235 = sst [smem:[#allocation32_spill]] %s3201_s5 }
   0x7   :  { %3236 = sst [smem:[#allocation33_spill]] %s3202_s6 }
   0x8   :  { %3237 = sst [smem:[#allocation34_spill]] %s3203_s7 }
   0x9   :  { %3238 = sst [smem:[#allocation35_spill]] %s3204_s8 }
   0xa   :  { %3239 = sst [smem:[#allocation36_spill]] %s3205_s9 }
   0xb   :  { %3240 = sst [smem:[#allocation37_spill]] %s3206_s10 }
   0xc   :  { %3241 = sst [smem:[#allocation38_spill]] %s3207_s11 }
   0xd   :  { %3242 = sst [smem:[#allocation39_spill]] %s3208_s12 }
   0xe   :  { %3243 = sst [smem:[#allocation40_spill]] %s3209_s13 }
   0xf   :  { %18 = vsyncpa [#allocation3], 0 }
  0x10   :  { %20 = vsyncpa [#allocation3 + $0x1], 0 }
  0x11   :  { %21 = vsyncpa [#allocation6], 0 }
  0x12   :  { %23 = vsyncpa [#allocation6 + $0x1], 0 }
  0x13   :  { %24 = vsyncpa [#allocation9], 0 }
  0x14   :  { %26 = vsyncpa [#allocation9 + $0x1], 0 }
  0x15   :  { %27 = vsyncpa [#allocation4], 0 }
  0x16   :  { %29 = vsyncpa [#allocation4 + $0x1], 0  ;;  %s2610_s25 = smov 0   ;;  %s2612_s26 = smov 0  }
  0x17   :  { %s2614_s27 = smov 0   ;;  %s2616_s28 = smov 0  }
  0x18   :  { %s2618_s29 = smov 0   ;;  %s2620_s30 = smov 0  }
  0x19   :  { %s2622_s14 = smov 0   ;;  %s2624_s15 = smov 0  }
  0x1a   :  { %s2626_s16 = smov 0   ;;  %s2628_s17 = smov 0  }
  0x1b   :  { %s2630_s18 = smov 0  }
  0x1c LB: > { %3244 = sst [smem:[#allocation15_spill]] %s2488_s27  ;;  %s2664_s19 = sadd.s32 4294967295, %s2520_s18   ;;  %s2520_s18 = sphi %s2630_s18, %s35_s18   ;;  %s2516_s17 = sphi %s2628_s17, %s3316_s17   ;;  %s2512_s16 = sphi %s2626_s16, %s3315_s16   ;;  %s2508_s15 = sphi %s2624_s15, %s3314_s15   ;;  %s2504_s14 = sphi %s2622_s14, %s3313_s14   ;;  %s2500_s30 = sphi %s2620_s30, %s3312_s30   ;;  %s2496_s29 = sphi %s2618_s29, %s3311_s29   ;;  %s2492_s28 = sphi %s2616_s28, %s3310_s28   ;;  %s2488_s27 = sphi %s2614_s27, %s3309_s27   ;;  %s2484_s26 = sphi %s2612_s26, %s3318_s26   ;;  %s2480_s25 = sphi %s2610_s25, %s3317_s25  }
  0x1d   : > { %3245 = sst [smem:[#allocation16_spill]] %s2492_s28  ;;  %s44_s20 = sadd.s32 1, %s2512_s16 }
  0x1e   : > { %3246 = sst [smem:[#allocation17_spill]] %s2496_s29  ;;  %p2667_p0 = scmp.ge.s32.totalorder %s44_s20, 2 }
  0x1f   : > { %3247 = sst [smem:[#allocation18_spill]] %s2500_s30  ;;  %p3216_p1 = scmp.eq.s32.totalorder %s2520_s18, 0 }
  0x20   : > { %3248 = sst [smem:[#allocation19_spill]] %s2504_s14  ;;  %p3215_p2 = scmp.eq.s32.totalorder %s2664_s19, 0 }
  0x21   : > { %3249 = sst [smem:[#allocation20_spill]] %s2508_s15  ;;  %s236_s22 = sadd.s32 1, %s2488_s27 }
  0x22   : > { %3250 = sst [smem:[#allocation21_spill]] %s2512_s16  ;;  %s3320_s20 = smov (%p2667_p0, %s44_s20), 0 }
  0x23   : > { %3251 = sst [smem:[#allocation22_spill]] %s2516_s17  ;;  %p243_p3 = scmp.ne.s32.totalorder %s2488_s27, %s2484_s26 }
  0x24   : > { %s3252_s21 = scalar_select %p2667_p0, 1, 0 }
  0x25   : > { %3253 = sst [smem:[#allocation23_spill]] %s3320_s20  ;;  %p249_p4 = scmp.ne.s32.totalorder %s2484_s26, %s2480_s25 }
  0x26   : > { %s233_s23 = ssub.s32 %s2512_s16, %s3320_s20  ;;  %p245_p6 = por %p243_p3, %p3216_p1 }
  0x27   : > { %p234_p5 = scmp.eq.s32.totalorder %s233_s23, 0  ;;  %p2687_p7 = por %p249_p4, %p3215_p2 }
  0x28   : > { %p3214_p8 = scmp.lt.s32.totalorder %s2520_s18, 4  ;;  %s487_s15 = sand.u32 1, %s2520_s18  }
  0x29   : > { %s3254_s24 = scalar_select %p2687_p7, 1, 0 }
  0x2a   : > { %s2693_s13 = scalar_select %p234_p5, %s2488_s27, %s236_s22  }
  0x2b   : > { %s2697_s11 = sand.u32 1, %s2488_s27   ;;  %s2700_s12 = sshll.u32 %s2512_s16, 4 }
  0x2c   : > { %3255 = sst [smem:[#allocation24_spill]] %s2693_s13  ;;  %s490_s25 = scalar_lea.vmem [#allocation5], %s2697_s11 }
  0x2d   : > { %s497_s20 = sshll.u32 %s490_s25, 4  ;;  %s3256_s7 = sld [smem:[#allocation34_spill]]  ;;  %s2709_s20 = int_to_ptr.vmem [resolvable:$true] %s497_s20 }
  0x2e   : > { %p2713_p9 = pnand %p3214_p8, %p245_p6  ;;  %s2719_s25 = scalar_lea.sflag [#allocation6], %s487_s15 }
  0x30   : > { %s3257_s22 = scalar_select %p2713_p9, 1, 0 }
  0x31   : > { %p2725_p13 = pneg %p2713_p9 }
  0x33   : > { %s2707_s6 = scalar_lea.hbm %s3256_s7, %s2700_s12  ;;  %s2275_s27 = scalar_lea.hbm %s3256_s7, 32 }
  0x34   : > { %s2270_s16 = scalar_lea.hbm %s2707_s6, 16  ;;  %p2276_p5 = scmp.lt.u32.totalorder %s2707_s6, %s3256_s7 }
  0x35   : > { %p2271_p12 = scmp.ne.s32.totalorder %s2707_s6, %s2270_s16  ;;  %p2277_p6 = scmp.lt.u32.totalorder %s2275_s27, %s2270_s16 }
  0x36   : > { %p2279_p2 = scmp.lt.u32.totalorder %s2270_s16, %s2707_s6 }
  0x37   : > { %p2273_p3 = pnand %p2725_p13, %p2271_p12  ;;  %p2278_p8 = por %p2277_p6, %p2276_p5 }
  0x39   : > { %p2274_p4 = pneg %p2273_p3  ;;  %p2280_p1 = por %p2279_p2, %p2278_p8 }
  0x3b   : > { %p2281_p10 = pnand %p2280_p1, %p2274_p4 }
  0x3d   : > { %2284 = shalt.err (!%p2281_p10)
}
  0x3e   : > { %s2285_s15 = scalar_lea.vmem %s2709_s20, 16  ;;  %s2522_s13 = smov [#allocation5]  }
  0x3f   : > { %p2286_p12 = scmp.ne.s32.totalorder %s2709_s20, %s2285_s15  ;;  %s2290_s23 = sshll.u32 %s2522_s13, 4  ;;  %s2291_s23 = int_to_ptr.vmem [resolvable:$false] %s2290_s23 }
  0x40   : > { %s2292_s3 = scalar_lea.vmem %s2291_s23, 32  ;;  %p2293_p7 = scmp.lt.s32.totalorder %s2709_s20, %s2291_s23 }
  0x41   : > { %p2288_p3 = pnand %p2286_p12, %p2725_p13  ;;  %p2294_p0 = scmp.lt.s32.totalorder %s2292_s3, %s2285_s15 }
  0x43   : > { %p2289_p11 = pneg %p2288_p3  ;;  %p2295_p5 = por %p2294_p0, %p2293_p7 }
  0x45   : > { %p2296_p6 = pnand %p2295_p5, %p2289_p11 }
  0x47   : > { %2299 = shalt.err (!%p2296_p6)
}
  0x48   : > { %2126 = dma.hbm_to_vmem [thread:$0]  (!%p2713_p9), %s2707_s6, 16, %s2709_s20, %s2719_s25  }
  0x49   : > { %p3259_p0 = scmp.lt.s32.totalorder %s2520_s18, 5  ;;  %p3260_p1 = scmp.ge.s32.totalorder %s2520_s18, 1 }
  0x4a   : > { %s1913_s27 = sadd.s32 4294967294, %s2520_s18   ;;  %s47_s16 = sadd.s32 1, %s2516_s17 }
  0x4b   : > { %p2753_p2 = pnand %p3260_p1, %p3259_p0  ;;  %s54_s15 = sadd.s32 1, %s2500_s30 }
  0x4c   : > { %p3262_p7 = scmp.ne.s32.totalorder %s3252_s21, 0  ;;  %p61_p8 = scmp.ne.s32.totalorder %s2500_s30, %s2496_s29 }
  0x4d   : > { %s3261_s5 = scalar_select %p2753_p2, 1, 0 }
  0x4e   : > { %s3322_s16 = smov (!%p3262_p7, %s47_s16), %s2516_s17  ;;  %p67_p10 = scmp.ne.s32.totalorder %s2496_s29, %s2492_s28 }
  0x4f   : > { %p49_p11 = scmp.ge.s32.totalorder %s3322_s16, 2  ;;  %p403_p4 = scmp.eq.s32.totalorder %s2664_s19, 3 }
  0x50   : > { %p3263_p12 = scmp.eq.s32.totalorder %s2520_s18, 0  ;;  %p3265_p5 = scmp.eq.s32.totalorder %s2664_s19, 0 }
  0x51   : > { %s3324_s16 = smov (%p49_p11, %s3322_s16), 0  ;;  %p2782_p0 = por %p403_p4, %p61_p8 }
  0x52   : > { %p2770_p3 = por %p3263_p12, %p61_p8  ;;  %p2776_p6 = por %p3265_p5, %p67_p10 }
  0x53   : > { %3267 = sst [smem:[#allocation25_spill]] %s3324_s16  ;;  %p409_p1 = scmp.eq.s32.totalorder %s1913_s27, 3 }
  0x54   : > { %s3266_s20 = scalar_select %p2776_p6, 1, 0 }
  0x55   : > { %s3268_s21 = scalar_select %p2782_p0, 1, 0 }
  0x56   : > { %s51_s13 = ssub.s32 %s2516_s17, %s3324_s16  ;;  %s429_s23 = sand.u32 1, %s2500_s30  }
  0x57   : > { %p52_p7 = scmp.eq.s32.totalorder %s51_s13, 0  ;;  %p2789_p12 = por %p409_p1, %p67_p10 }
  0x58   : > { %s1916_s7 = sshll.u32 %s429_s23, 3  ;;  %s1917_s4 = sshll.u32 %s2516_s17, 7 }
  0x59   : > { %s3269_s3 = scalar_select %p2789_p12, 1, 0 }
  0x5a   : > { %s2794_s28 = scalar_select %p52_p7, %s2500_s30, %s54_s15  }
  0x5b   : > { %s3271_s0 = sld [smem:[#allocation27_spill]]  ;;  %s433_s27 = scalar_lea.vmem [#allocation2], %s1916_s7 }
  0x5c   : > { %3270 = sst [smem:[#allocation26_spill]] %s2794_s28  ;;  %s440_s16 = sshll.u32 %s433_s27, 4  ;;  %s2802_s16 = int_to_ptr.vmem [resolvable:$true] %s440_s16 }
  0x5d   : > { %p3272_p8 = scmp.lt.s32.totalorder %s2520_s18, 4  ;;  %s3274_s8 = sld [smem:[#allocation35_spill]] }
  0x5e   : > { %s507_s2 = scalar_lea.vmem [#allocation7], %s2697_s11  ;;  %s430_s7 = scalar_lea.sflag [#allocation3], %s429_s23 }
  0x5f   : > { %p2808_p10 = pnand %p3272_p8, %p2770_p3 }
  0x61   : > { %s2800_s14 = scalar_lea.hbm %s3271_s0, %s1917_s4  ;;  %s2819_s4 = sshll.u32 %s507_s2, 4  ;;  %s515_s4 = int_to_ptr.vmem [resolvable:$true] %s2819_s4 }
  0x62   : > { %s2300_s27 = scalar_lea.hbm %s2800_s14, 128  ;;  %p2302_p4 = pneg %p2808_p10 }
  0x63   : > { %s2816_s1 = scalar_lea.hbm %s3274_s8, %s2700_s12  ;;  %p2301_p11 = scmp.ne.s32.totalorder %s2800_s14, %s2300_s27 }
  0x64   : > { %s2305_s17 = scalar_lea.hbm %s3271_s0, 256  ;;  %p2306_p1 = scmp.lt.u32.totalorder %s2800_s14, %s3271_s0 }
  0x65   : > { %p2303_p3 = pnand %p2302_p4, %p2301_p11  ;;  %p2307_p7 = scmp.lt.u32.totalorder %s2305_s17, %s2300_s27 }
  0x66   : > { %p2309_p12 = scmp.lt.u32.totalorder %s2300_s27, %s2800_s14 }
  0x67   : > { %p2304_p5 = pneg %p2303_p3  ;;  %p2308_p8 = por %p2307_p7, %p2306_p1 }
  0x69   : > { %p2310_p0 = por %p2309_p12, %p2308_p8 }
  0x6b   : > { %p2311_p6 = pnand %p2310_p0, %p2304_p5 }
  0x6d   : > { %2314 = shalt.err (!%p2311_p6)
}
  0x6e   : > { %s2315_s23 = scalar_lea.vmem %s2802_s16, 128  ;;  %s2523_s28 = smov [#allocation2]  }
  0x6f   : > { %p2316_p11 = scmp.ne.s32.totalorder %s2802_s16, %s2315_s23  ;;  %s2320_s2 = sshll.u32 %s2523_s28, 4  ;;  %s2321_s2 = int_to_ptr.vmem [resolvable:$false] %s2320_s2 }
  0x70   : > { %s2322_s30 = scalar_lea.vmem %s2321_s2, 256  ;;  %p2323_p9 = scmp.lt.s32.totalorder %s2802_s16, %s2321_s2 }
  0x71   : > { %p2318_p3 = pnand %p2316_p11, %p2302_p4  ;;  %p2324_p1 = scmp.lt.s32.totalorder %s2322_s30, %s2315_s23 }
  0x73   : > { %p2319_p2 = pneg %p2318_p3  ;;  %p2325_p7 = por %p2324_p1, %p2323_p9 }
  0x75   : > { %p2326_p12 = pnand %p2325_p7, %p2319_p2 }
  0x77   : > { %2329 = shalt.err (!%p2326_p12)
}
  0x78   : > { %2123 = dma.hbm_to_vmem [thread:$0]  (!%p2808_p10), %s2800_s14, 128, %s2802_s16, %s430_s7  }
  0x79   : > { %s2330_s27 = scalar_lea.hbm %s2816_s1, 16  ;;  %s2335_s15 = scalar_lea.hbm %s3274_s8, 32 }
  0x7a   : > { %p2331_p6 = scmp.ne.s32.totalorder %s2816_s1, %s2330_s27  ;;  %p2336_p9 = scmp.lt.u32.totalorder %s2816_s1, %s3274_s8 }
  0x7b   : > { %p2337_p2 = scmp.lt.u32.totalorder %s2335_s15, %s2330_s27  ;;  %p2339_p8 = scmp.lt.u32.totalorder %s2330_s27, %s2816_s1 }
  0x7c   : > { %p2333_p0 = pnand %p2331_p6, %p2725_p13 }
  0x7d   : > { %p2338_p5 = por %p2337_p2, %p2336_p9 }
  0x7e   : > { %p2334_p4 = pneg %p2333_p0 }
  0x7f   : > { %p2340_p11 = por %p2339_p8, %p2338_p5 }
  0x81   : > { %p2341_p3 = pnand %p2340_p11, %p2334_p4 }
  0x83   : > { %2344 = shalt.err (!%p2341_p3)
}
  0x84   : > { %s2345_s14 = scalar_lea.vmem %s515_s4, 16  ;;  %s2524_s16 = smov [#allocation7]  }
  0x85   : > { %p2346_p10 = scmp.ne.s32.totalorder %s515_s4, %s2345_s14  ;;  %s2350_s7 = sshll.u32 %s2524_s16, 4  ;;  %s2351_s7 = int_to_ptr.vmem [resolvable:$false] %s2350_s7 }
  0x86   : > { %s2352_s28 = scalar_lea.vmem %s2351_s7, 32  ;;  %p2353_p12 = scmp.lt.s32.totalorder %s515_s4, %s2351_s7 }
  0x87   : > { %p2348_p1 = pnand %p2346_p10, %p2725_p13  ;;  %p2354_p6 = scmp.lt.s32.totalorder %s2352_s28, %s2345_s14 }
  0x89   : > { %p2349_p7 = pneg %p2348_p1  ;;  %p2355_p0 = por %p2354_p6, %p2353_p12 }
  0x8b   : > { %p2356_p2 = pnand %p2355_p0, %p2349_p7 }
  0x8d   : > { %2359 = shalt.err (!%p2356_p2)
}
  0x8e   : > { %p3275_p9 = scmp.ne.s32.totalorder %s3257_s22, 0  ;;  %s3276_s10 = sld [smem:[#allocation37_spill]] }
  0x8f   : > { %s532_s6 = scalar_lea.vmem [#allocation8], %s2697_s11  ;;  %s530_s15 = scalar_lea.sflag [#allocation9], %s2697_s11 }
  0x90   : > { %2129 = dma.hbm_to_vmem [thread:$0]  (!%p3275_p9), %s2816_s1, 16, %s515_s4, %s2719_s25  }
  0x91   : > { %s539_s17 = sshll.u32 %s532_s6, 4  ;;  %s540_s17 = int_to_ptr.vmem [resolvable:$true] %s539_s17 }
  0x94   : > { %s2869_s27 = scalar_lea.hbm %s3276_s10, %s2700_s12  ;;  %s2365_s1 = scalar_lea.hbm %s3276_s10, 32 }
  0x95   : > { %s2360_s13 = scalar_lea.hbm %s2869_s27, 16  ;;  %p2366_p11 = scmp.lt.u32.totalorder %s2869_s27, %s3276_s10 }
  0x96   : > { %p2361_p4 = scmp.ne.s32.totalorder %s2869_s27, %s2360_s13  ;;  %p2367_p3 = scmp.lt.u32.totalorder %s2365_s1, %s2360_s13 }
  0x97   : > { %p2369_p1 = scmp.lt.u32.totalorder %s2360_s13, %s2869_s27 }
  0x98   : > { %p2363_p5 = pnand %p2361_p4, %p2725_p13  ;;  %p2368_p10 = por %p2367_p3, %p2366_p11 }
  0x9a   : > { %p2364_p8 = pneg %p2363_p5  ;;  %p2370_p7 = por %p2369_p1, %p2368_p10 }
  0x9c   : > { %p2371_p12 = pnand %p2370_p7, %p2364_p8 }
  0x9e   : > { %2374 = shalt.err (!%p2371_p12)
}
  0x9f   : > { %s2375_s11 = scalar_lea.vmem %s540_s17, 16  ;;  %s2525_s14 = smov [#allocation8]  }
  0xa0   : > { %p2376_p6 = scmp.ne.s32.totalorder %s540_s17, %s2375_s11  ;;  %s2380_s16 = sshll.u32 %s2525_s14, 4  ;;  %s2381_s16 = int_to_ptr.vmem [resolvable:$false] %s2380_s16 }
  0xa1   : > { %s2382_s7 = scalar_lea.vmem %s2381_s16, 32  ;;  %p2383_p4 = scmp.lt.s32.totalorder %s540_s17, %s2381_s16 }
  0xa2   : > { %p2378_p0 = pnand %p2376_p6, %p2725_p13  ;;  %p2384_p5 = scmp.lt.s32.totalorder %s2382_s7, %s2375_s11 }
  0xa4   : > { %p2379_p2 = pneg %p2378_p0  ;;  %p2385_p9 = por %p2384_p5, %p2383_p4 }
  0xa6   : > { %p2386_p3 = pnand %p2385_p9, %p2379_p2 }
  0xa8   : > { %2389 = shalt.err (!%p2386_p3)
}
  0xa9   : > { %p3277_p11 = scmp.ne.s32.totalorder %s3257_s22, 0  ;;  %p3278_p8 = scmp.ne.s32.totalorder %s3261_s5, 0 }
  0xaa   : > { %s2893_s9 = sand.u32 (!%p3278_p8), 1, %s2496_s29   ;;  %p3279_p13 = scmp.ne.s32.totalorder (!%p3278_p8), %s3266_s20, 0 }
  0xab   : > { %2132 = dma.hbm_to_vmem [thread:$0]  (!%p3277_p11), %s2869_s27, 16, %s540_s17, %s530_s15  }
  0xac   : > { %562 = sbr.rel (%p3278_p8) target bundleno = 3911 (0xf47), region = 72  ;;  %s3228_s28 = sshll.u32 (!%p3278_p8), %s2893_s9, 3 }
  0xad   : > { %s565_s2 = scalar_lea.sflag (!%p3278_p8), [#allocation3], %s2893_s9  ;;  %s568_s30 = scalar_lea.vmem (!%p3278_p8), [#allocation2], %s3228_s28 }
  0xb3   : > { %2463 = dma.done.wait (%p3279_p13), %s565_s2, 128  }
  0xb4   : > { %2465 = vsyncadd (%p3279_p13), %s565_s2, 4294967168  ;;  %s573_s22 = sand.u32 1, %s2664_s19   ;;  %s2905_s5 = sand.u32 1, %s2484_s26  }
  0xb5   : > { %s574_s27 = scalar_lea.sflag [#allocation6], %s573_s22  ;;  %p3280_p9 = scmp.ne.s32.totalorder %s3254_s24, 0 }
  0xb7   : > { %2467 = dma.done.wait (%p3280_p9), %s574_s27, 32  }
  0xb8   : > { %2469 = vsyncadd (%p3280_p9), %s574_s27, 4294967264  ;;  %s590_s17 = scalar_lea.sflag [#allocation9], %s2905_s5 }
  0xb9   : > { %2471 = dma.done.wait (%p3280_p9), %s590_s17, 16  }
  0xba   : > { %2473 = vsyncadd (%p3280_p9), %s590_s17, 4294967280  ;;  %s3281_s19 = sld [smem:[#allocation19_spill]]  ;;  %s3285_s20 = sld [smem:[#allocation30_spill]] }
  0xbb   : > { %s3286_s28 = sld [smem:[#allocation32_spill]]  ;;  %s3287_s4 = sld [smem:[#allocation33_spill]] }
  0xbc   : > { %s3288_s11 = sld [smem:[#allocation36_spill]]  ;;  %s3289_s27 = sld [smem:[#allocation39_spill]] }
  0xbd   : > { %s3290_s29 = sld [smem:[#allocation38_spill]] }
  0xc0   : > { %p682_p10 = scmp.lt.s32.totalorder %s3281_s19, 1  ;;  %p1932_p1 = scmp.ne.s32.totalorder %s3281_s19, 0 }
  0xc1   : > { %v722_v0 = vld [vmem:[%s568_s30] sm:$0xff] (!%p1932_p1)  ;;  %vm723_vm0 = vcmask (!%p1932_p1), 261120  }
  0xc2   : > { %s2921_s13 = scalar_select %p682_p10, %s3281_s19, 1 }
  0xc3   : > { %721 = sbr.rel (%p1932_p1) target bundleno = 203 (0xcb), region = 92 }
  0xc4   : > { %s1971_s16 = sshll.u32 %s2921_s13, 4  ;;  %s703_s10 = scalar_lea.vmem %s3287_s4, %s2921_s13 }
  0xc5   : > { %s692_s23 = scalar_lea.vmem %s3285_s20, %s1971_s16  ;;  %s2942_s0 = scalar_lea.vmem %s3286_s28, %s1971_s16 }
  0xc6   : > { %s2951_s14 = scalar_lea.vmem %s3288_s11, %s1971_s16  ;;  %s1974_s7 = sshll.u32 %s2921_s13, 5 }
  0xc7   : > { %s716_s15 = scalar_lea.vmem %s3289_s27, %s2921_s13  ;;  %s2961_s6 = scalar_lea.vmem %s3290_s29, %s1974_s7 }
  0xc8   : > { %s3291_s28 = sshll.u32 %s2893_s9, 3 }
  0xc9   : > { %s2965_s25 = scalar_lea.vmem [#allocation10], %s3291_s28 }
  0xca   : > { %724 = vst.msk [vmem:[%s2965_s25] sm:$0xff] %vm723_vm0, %v722_v0 }
  0xcb PF: > { %vm728_vm1 = vcmask 261120   ;;  %v2240_v8 = vld [vmem:[%s692_s23] sm:$0xff]   ;;  %v2526_v9 = vmov 0.0   ;;  %vm2527_vm2 = vmmov 0   ;;  %v2241_v10 = vld [vmem:[%s692_s23 + $0x8] sm:$0xff]   ;;  %s3292_s30 = sld [smem:[#allocation28_spill]] }
  0xcc   : > { %2010 = vmatprep.subr.bf16.mxu1 %v2526_v9  ;;  %2014 = vmatprep.mubr.msk.bf16.mxu1 %vm2527_vm2, %v2526_v9  ;;  %s3294_s27 = sld [smem:[#allocation29_spill]]  ;;  %s3296_s24 = sld [smem:[#allocation31_spill]]  ;;  %vm828_vm3 = vcmask 64512   ;;  %vm893_vm4 = vcmask 1043456   ;;  %vm1621_vm5 = vcmask 523264  }
  0xcd   : > { %2011 = vmatpush3.bf16.msra.mxu1 %v2240_v8  ;;  %2024 = vmatprep.subr.bf16.mxu0 %v2526_v9  ;;  %s2528_s7 = smov 120   ;;  %s2529_s2 = smov 96  }
  0xce   : > { %2012 = vmatprep.subr.bf16.mxu1 %v2526_v9  ;;  %2026 = vmatprep.mubr.msk.bf16.mxu0 %vm2527_vm2, %v2526_v9  ;;  %s2530_s22 = smov 88   ;;  %s2531_s20 = smov 56  }
  0xcf   : > { %s2532_s17 = smov 64   ;;  %s2533_s28 = smov 80  }
  0xd0   : > { %s2534_s8 = smov 112   ;;  %s2535_s29 = smov 48  }
  0xd1   : > { %v2970_v1 = vld [vmem:[%s2965_s25] sm:$0xff]  ;;  %2013 = vmatpush3.bf16.msra.mxu1 %v2241_v10  ;;  %s3293_s19 = scalar_lea.vmem %s3292_s30, %s2921_s13  ;;  %s2536_s30 = smov 104  }
  0xd2   : > { %v729_v2 = vsel %vm728_vm1, %v2970_v1, 0.0  ;;  %2018 = vmatprep.subr.bf16.mxu1 %v2526_v9  ;;  %v1933_v15 = vld [vmem:[%s3293_s19] ss:$0 sm:$0xff]  ;;  %s3295_s23 = scalar_lea.vmem %s3294_s27, %s2921_s13  ;;  %s3297_s11 = scalar_lea.vmem %s3296_s24, %s2921_s13 }
  0xd3   : > { %730 = vadd.xlane.f32.xlu0 %v729_v2  ;;  %v1934_v17 = vld [vmem:[%s3295_s23] ss:$0 sm:$0xff]  ;;  %s2537_s19 = smov 72   ;;  %s2538_s4 = smov 40  }
  0xd4   : > { %v1935_v21 = vld [vmem:[%s3297_s11] ss:$0 sm:$0xff]  ;;  %s3300_s23 = scalar_lea.vmem [#allocation7], %s2905_s5  ;;  %s3302_s1 = sld [smem:[#allocation20_spill]] }
  0xd5   : > { %s1681_s11 = sshll.u32 %s2965_s25, 4  ;;  %s1668_s13 = scalar_lea.sflag [#allocation4], %s2893_s9  ;;  %s3133_s11 = int_to_ptr.vmem [resolvable:$true] %s1681_s11 }
  0xd6   : > { %p3305_p12 = scmp.ne.s32.totalorder %s3268_s21, 0 }
  0xda   : > { %s1968_s24 = sshll.u32 %s3302_s1, 7 }
 0x160   : > { %v731_v3 = vpop.xlane.xlu0 %730 }
 0x161   : > { %v733_v4 = vmul.f32 0.03125, %v731_v3 }
 0x163   : > { %v734_v5 = vsub.f32 %v2970_v1, %v733_v4  ;;  %v938_v4 = vld [vmem:[%s2942_s0] sm:$0xf] }
 0x165   : > { %v735_v6 = vmul.f32 %v734_v5, %v734_v5 }
 0x167   : > { %v736_v7 = vsel %vm728_vm1, %v735_v6, 0.0  ;;  %v1943_v6 = vld [vmem:[%s2942_s0 + $0x4] sm:$0xf] }
 0x168   : > { %737 = vadd.xlane.f32.xlu0 %v736_v7  ;;  %v1057_v7 = vsel %vm893_vm4, %v1943_v6, 0 }
 0x1f5   : > { %v738_v11 = vpop.xlane.xlu0 %737 }
 0x1f6   : > { %v739_v12 = vmul.f32 0.03125, %v738_v11 }
 0x1f8   : > { %v740_v13 = vadd.f32 1e-05, %v739_v12 }
 0x1fa   : > { %2248 = vrsqrt.f32 %v740_v13 }
 0x204   : > { %v2249_v14 = vpop.eup %2248 }
 0x205   : > { %v742_v16 = vmul.f32 %v2249_v14, %v734_v5  ;;  %v1103_v5 = vsel %vm893_vm4, %v938_v4, 0 }
 0x207   : > { %v749_v18 = vmul.f32 %v1933_v15, %v742_v16 }
 0x209   : > { %v756_v19 = vadd.f32 %v1934_v17, %v749_v18 }
 0x20b   : > { %v757_v20 = vpack.c.bf16 %v756_v19, %v756_v19 }
 0x20d   : > { %2015 = vmatmul.mubr.msk.bf16.vlgmr.msra.gmra.mrb[0].mxu1 %vm728_vm1, %v757_v20 }
 0x20e   : > { %2020 = vmatprep.mubr.msk.bf16.mxu1 %vm2527_vm2, %v2526_v9 }
 0x2e0   : > { %v818_v22 = vpop.f32.mrb[0].mxu1 }
 0x2e1   : > { %v819_v23 = vadd.f32 %v1935_v21, %v818_v22  ;;  %v2016_v24 = vpop.f32.mrb[1].mxu1 }
 0x2e2   : > { %v821_v25 = vpop.f32.mrb[2].mxu1 }
 0x2e3   : > { %v3002_v26 = vpack.c.bf16 %v819_v23, %v819_v23  ;;  %v2017_v27 = vpop.f32.mrb[3].mxu1 }
 0x2e5   : > { %939 = vrot.lane.b32.xlu0 %v3002_v26, %s2528_s7  ;;  %826 = vrot.lane.b32.xlu1 %v3002_v26, %s2529_s2 }
 0x2e9   : > { %941 = vrot.lane.b32.xlu1 %v3002_v26, %s2530_s22  ;;  %s3304_s22 = sld [smem:[#allocation40_spill]] }
 0x357   : > { %v827_v28 = vpop.permute.xlu1 %826  ;;  %v940_v32 = vpop.permute.xlu0 %939 }
 0x358   : > { %v833_v29 = vsel %vm828_vm3, %v827_v28, 0 }
 0x359   : > { %2019 = vmatpush3.bf16.xpose.msra.mxu1 %v833_v29 }
 0x35a   : > { %2030 = vmatprep.subr.bf16.mxu1 %v2526_v9 }
 0x35b   : > { %v942_v30 = vpop.permute.xlu1 %941 }
 0x35c   : > { %v947_v31 = vsel %vm828_vm3, %v942_v30, 0 }
 0x360   : > { %2021 = vmatmul.mubr.msk.bf16.vlgmr.msra.gmra.mrb[4].mxu1 %vm828_vm3, %v3002_v26 }
 0x361   : > { %2031 = vmatpush3.bf16.xpose.msra.mxu1 %v947_v31  ;;  %2032 = vmatprep.mubr.msk.bf16.mxu1 %vm2527_vm2, %v2526_v9 }
 0x362   : > { %2042 = vmatprep.subr.bf16.mxu1 %v2526_v9 }
 0x368   : > { %2033 = vmatmul.mubr.msk.bf16.vlgmr.msra.gmra.mrb[8].mxu1 %vm828_vm3, %v940_v32 }
 0x369   : > { %2044 = vmatprep.mubr.msk.bf16.mxu1 %vm2527_vm2, %v2526_v9  ;;  %2043 = vmatpush3.bf16.msra.mxu1 %v1057_v7  ;;  %v1952_v7 = vld [vmem:[%s2942_s0 + $0xc] sm:$0xf] }
 0x36a   : > { %2054 = vmatprep.subr.bf16.mxu1 %v2526_v9 }
 0x433   : > { %v869_v33 = vpop.f32.mrb[4].mxu1 }
 0x434   : > { %v875_v34 = vmul.f32 0.35355338, %v869_v33  ;;  %v2022_v35 = vpop.f32.mrb[5].mxu1 }
 0x435   : > { %v872_v36 = vpop.f32.mrb[6].mxu1 }
 0x436   : > { %v2023_v37 = vpop.f32.mrb[7].mxu1  ;;  %v876_v38 = vsel %vm828_vm3, %v875_v34, -inf }
 0x437   : > { %877 = vmax.xlane.f32.xlu1 %v876_v38 }
 0x43b   : > { %v983_v39 = vpop.f32.mrb[8].mxu1 }
 0x43c   : > { %v989_v40 = vmul.f32 0.35355338, %v983_v39  ;;  %v2034_v41 = vpop.f32.mrb[9].mxu1 }
 0x43d   : > { %v986_v42 = vpop.f32.mrb[10].mxu1 }
 0x43e   : > { %v2035_v43 = vpop.f32.mrb[11].mxu1  ;;  %v990_v44 = vsel %vm828_vm3, %v989_v40, -inf }
 0x43f   : > { %991 = vmax.xlane.f32.xlu0 %v990_v44 }
 0x455   : > { %1002 = vrot.lane.b32.xlu0 %v3002_v26, %s2531_s20  ;;  %s3131_s20 = scalar_lea.hbm %s3304_s22, %s1968_s24 }
 0x4c4   : > { %v878_v45 = vpop.xlane.xlu1 %877 }
 0x4c5   : > { %v879_v46 = vsub.f32 %v875_v34, %v878_v45 }
 0x4c7   : > { %v880_v47 = vmul.f32 1.442695, %v879_v46 }
 0x4c9   : > { %2250 = vpow2.f32 %v880_v47 }
 0x4cc   : > { %v992_v48 = vpop.xlane.xlu0 %991 }
 0x4cd   : > { %v993_v49 = vsub.f32 %v989_v40, %v992_v48 }
 0x4cf   : > { %v994_v50 = vmul.f32 1.442695, %v993_v49 }
 0x4d0   : > { %v1003_v61 = vpop.permute.xlu0 %1002 }
 0x4d1   : > { %2252 = vpow2.f32 %v994_v50  ;;  %v1008_v63 = vsel %vm893_vm4, %v1003_v61, 0 }
 0x4d3   : > { %v2251_v51 = vpop.eup %2250 }
 0x4d4   : > { %v882_v52 = vsel %vm828_vm3, %v2251_v51, 0.0 }
 0x4d5   : > { %883 = vadd.xlane.f32.xlu1 %v882_v52  ;;  %v1948_v52 = vld [vmem:[%s2942_s0 + $0x8] sm:$0xf] }
 0x4db   : > { %v2253_v53 = vpop.eup %2252 }
 0x4dc   : > { %v996_v54 = vsel %vm828_vm3, %v2253_v53, 0.0 }
 0x4dd   : > { %997 = vadd.xlane.f32.xlu1 %v996_v54 }
 0x4ee   : > { %888 = vrot.lane.b32.xlu1 %v3002_v26, %s2532_s17  ;;  %s2539_s17 = smov [#allocation10]  }
 0x4f2   : > { %1147 = vrot.lane.b32.xlu1 %v3002_v26, %s2533_s28  ;;  %s2394_s28 = sshll.u32 %s2539_s17, 4  ;;  %s2395_s28 = int_to_ptr.vmem [resolvable:$false] %s2394_s28 }
 0x4f3   : > { %p2397_p2 = scmp.lt.s32.totalorder %s3133_s11, %s2395_s28 }
 0x4f6   : > { %1145 = vrot.lane.b32.xlu1 %v3002_v26, %s2534_s8  ;;  %s2396_s8 = scalar_lea.vmem %s2395_s28, 256 }
 0x562   : > { %v884_v55 = vpop.xlane.xlu1 %883 }
 0x563   : > { %2254 = vrcp.f32 %v884_v55 }
 0x56a   : > { %v998_v56 = vpop.xlane.xlu1 %997 }
 0x56b   : > { %2256 = vrcp.f32 %v998_v56 }
 0x56d   : > { %v2255_v57 = vpop.eup %2254 }
 0x56e   : > { %v889_v58 = vpop.permute.xlu1 %888  ;;  %v886_v59 = vmul.f32 %v2255_v57, %v2251_v51 }
 0x56f   : > { %v895_v60 = vsel %vm893_vm4, %v889_v58, 0 }
 0x570   : > { %2025 = vmatpush3.bf16.msra.mxu0 %v895_v60  ;;  %v887_v62 = vpack.c.bf16 %v886_v59, %v886_v59 }
 0x571   : > { %2036 = vmatprep.subr.bf16.mxu0 %v2526_v9 }
 0x572   : > { %v1148_v14 = vpop.permute.xlu1 %1147 }
 0x573   : > { %2027 = vmatmul.mubr.msk.bf16.vlgmr.msra.gmra.mrb[0].mxu0 %vm828_vm3, %v887_v62  ;;  %v1153_v19 = vsel %vm828_vm3, %v1148_v14, 0 }
 0x574   : > { %2037 = vmatpush3.bf16.msra.mxu0 %v1008_v63  ;;  %2038 = vmatprep.mubr.msk.bf16.mxu0 %vm2527_vm2, %v2526_v9 }
 0x575   : > { %v2257_v0 = vpop.eup %2256  ;;  %2048 = vmatprep.subr.bf16.mxu0 %v2526_v9 }
 0x576   : > { %v1000_v2 = vmul.f32 %v2257_v0, %v2253_v53  ;;  %v1146_v21 = vpop.permute.xlu1 %1145  ;;  %v1263_v53 = vsel %vm893_vm4, %v1948_v52, 0  ;;  %v2245_v52 = vld [vmem:[%s2961_s6 + $0x8] sm:$0xff]  }
 0x578   : > { %v1001_v3 = vpack.c.bf16 %v1000_v2, %v1000_v2 }
 0x57b   : > { %2039 = vmatmul.mubr.msk.bf16.vlgmr.msra.gmra.mrb[4].mxu0 %vm828_vm3, %v1001_v3 }
 0x57c   : > { %2050 = vmatprep.mubr.msk.bf16.mxu0 %vm2527_vm2, %v2526_v9  ;;  %2049 = vmatpush3.bf16.msra.mxu0 %v1103_v5 }
 0x57d   : > { %2060 = vmatprep.subr.bf16.mxu0 %v2526_v9 }
 0x646   : > { %v931_v8 = vpop.f32.mrb[0].mxu0 }
 0x647   : > { %v937_v10 = vpack.c.bf16 %v931_v8, %v931_v8  ;;  %v2028_v11 = vpop.f32.mrb[1].mxu0  ;;  %v1424_v8 = vsel %vm893_vm4, %v1952_v7, 0  ;;  %v1961_v7 = vld [vmem:[%s716_s15] ss:$0 sm:$0xff]  ;;  %s2390_s15 = scalar_lea.vmem %s3133_s11, 128 }
 0x648   : > { %v934_v12 = vpop.f32.mrb[2].mxu0  ;;  %p2391_p7 = scmp.ne.s32.totalorder %s3133_s11, %s2390_s15  ;;  %p2398_p4 = scmp.lt.s32.totalorder %s2396_s8, %s2390_s15 }
 0x649   : > { %v2029_v13 = vpop.f32.mrb[3].mxu0  ;;  %2051 = vmatmul.mubr.msk.bf16.vlgmr.msra.gmra.mrb[8].mxu0 %vm828_vm3, %v937_v10 }
 0x64a   : > { %2062 = vmatprep.mubr.msk.bf16.mxu0 %vm2527_vm2, %v2526_v9  ;;  %p2392_p6 = pnand %p2391_p7, %p3305_p12  ;;  %p2399_p5 = por %p2398_p4, %p2397_p2 }
 0x64c   : > { %p2393_p0 = pneg %p2392_p6 }
 0x64e   : > { %v1044_v15 = vpop.f32.mrb[4].mxu0  ;;  %p2400_p3 = pnand %p2399_p5, %p2393_p0 }
 0x64f   : > { %v1050_v16 = vpack.c.bf16 %v1044_v15, %v1044_v15  ;;  %v2040_v17 = vpop.f32.mrb[5].mxu0 }
 0x650   : > { %v1047_v18 = vpop.f32.mrb[6].mxu0 }
 0x651   : > { %v2041_v20 = vpop.f32.mrb[7].mxu0  ;;  %2045 = vmatmul.mubr.msk.bf16.vlgmr.msra.gmra.mrb[12].mxu1 %vm828_vm3, %v1050_v16 }
 0x652   : > { %2055 = vmatpush3.bf16.xpose.msra.mxu1 %v1153_v19  ;;  %2056 = vmatprep.mubr.msk.bf16.mxu1 %vm2527_vm2, %v2526_v9 }
 0x653   : > { %2066 = vmatprep.subr.bf16.mxu1 %v2526_v9 }
 0x659   : > { %2057 = vmatmul.mubr.msk.bf16.vlgmr.msra.gmra.mrb[16].mxu1 %vm828_vm3, %v1146_v21 }
 0x65a   : > { %2068 = vmatprep.mubr.msk.bf16.mxu1 %vm2527_vm2, %v2526_v9  ;;  %2067 = vmatpush3.bf16.msra.mxu1 %v1263_v53  ;;  %v2246_v53 = vld [vmem:[%s2961_s6 + $0x10] sm:$0xff]  }
 0x65b   : > { %2078 = vmatprep.subr.bf16.mxu1 %v2526_v9 }
 0x71c   : > { %v1139_v22 = vpop.f32.mrb[8].mxu0 }
 0x71d   : > { %v2052_v23 = vpop.f32.mrb[9].mxu0 }
 0x71e   : > { %v1142_v24 = vpop.f32.mrb[10].mxu0 }
 0x71f   : > { %v2053_v25 = vpop.f32.mrb[11].mxu0 }
 0x724   : > { %v1093_v27 = vpop.f32.mrb[12].mxu1 }
 0x725   : > { %v3053_v28 = vadd.f32 %v1139_v22, %v1093_v27  ;;  %v2046_v29 = vpop.f32.mrb[13].mxu1  ;;  %v1954_v27 = vld [vmem:[%s703_s10] ss:$0 sm:$0xff]  ;;  %s3299_s10 = scalar_lea.vmem [#allocation5], %s2905_s5 }
 0x726   : > { %v1096_v30 = vpop.f32.mrb[14].mxu1 }
 0x727   : > { %v2047_v31 = vpop.f32.mrb[15].mxu1 }
 0x72c   : > { %v1189_v32 = vpop.f32.mrb[16].mxu1 }
 0x72d   : > { %v1195_v33 = vmul.f32 0.35355338, %v1189_v32  ;;  %v2058_v34 = vpop.f32.mrb[17].mxu1 }
 0x72e   : > { %v1192_v35 = vpop.f32.mrb[18].mxu1 }
 0x72f   : > { %v2059_v36 = vpop.f32.mrb[19].mxu1  ;;  %v1196_v37 = vsel %vm828_vm3, %v1195_v33, -inf }
 0x730   : > { %1197 = vmax.xlane.f32.xlu1 %v1196_v37 }
 0x741   : > { %1208 = vrot.lane.b32.xlu1 %v3002_v26, %s2535_s29 }
 0x745   : > { %1306 = vrot.lane.b32.xlu1 %v3002_v26, %s2536_s30 }
 0x7bd   : > { %v1198_v38 = vpop.xlane.xlu1 %1197 }
 0x7be   : > { %v1199_v39 = vsub.f32 %v1195_v33, %v1198_v38 }
 0x7c0   : > { %v1200_v40 = vmul.f32 1.442695, %v1199_v39 }
 0x7c1   : > { %v1209_v41 = vpop.permute.xlu1 %1208 }
 0x7c2   : > { %2258 = vpow2.f32 %v1200_v40  ;;  %v1214_v42 = vsel %vm893_vm4, %v1209_v41, 0  ;;  %v2242_v40 = vld [vmem:[%s2951_s14] sm:$0xff]   ;;  %v2243_v41 = vld [vmem:[%s2951_s14 + $0x8] sm:$0xff]   ;;  %s3301_s14 = scalar_lea.vmem [#allocation8], %s2905_s5 }
 0x7c3   : > { %2061 = vmatpush3.bf16.msra.mxu0 %v1214_v42 }
 0x7c4   : > { %2072 = vmatprep.subr.bf16.mxu0 %v2526_v9 }
 0x7c5   : > { %v1307_v51 = vpop.permute.xlu1 %1306 }
 0x7cc   : > { %v2259_v43 = vpop.eup %2258 }
 0x7cd   : > { %v1202_v44 = vsel %vm828_vm3, %v2259_v43, 0.0 }
 0x7ce   : > { %1203 = vadd.xlane.f32.xlu0 %v1202_v44 }
 0x7e4   : > { %1308 = vrot.lane.b32.xlu0 %v3002_v26, %s2537_s19 }
 0x85b   : > { %v1204_v45 = vpop.xlane.xlu0 %1203 }
 0x85c   : > { %2260 = vrcp.f32 %v1204_v45  ;;  %v1955_v45 = vld [vmem:[%s3299_s10] ss:$0 sm:$0xff] }
 0x85f   : > { %v1309_v48 = vpop.permute.xlu0 %1308 }
 0x860   : > { %v1314_v50 = vsel %vm828_vm3, %v1309_v48, 0 }
 0x866   : > { %v2261_v46 = vpop.eup %2260 }
 0x867   : > { %v1206_v47 = vmul.f32 %v2261_v46, %v2259_v43 }
 0x869   : > { %v1207_v49 = vpack.c.bf16 %v1206_v47, %v1206_v47  ;;  %v1956_v47 = vld [vmem:[%s3300_s23] ss:$0 sm:$0xff] }
 0x86b   : > { %2063 = vmatmul.mubr.msk.bf16.vlgmr.msra.gmra.mrb[12].mxu0 %vm828_vm3, %v1207_v49 }
 0x86c   : > { %2073 = vmatpush3.bf16.xpose.msra.mxu0 %v1314_v50  ;;  %2074 = vmatprep.mubr.msk.bf16.mxu0 %vm2527_vm2, %v2526_v9 }
 0x86d   : > { %2084 = vmatprep.subr.bf16.mxu0 %v2526_v9 }
 0x873   : > { %2075 = vmatmul.mubr.msk.bf16.vlgmr.msra.gmra.mrb[16].mxu0 %vm828_vm3, %v1307_v51  ;;  %v2244_v51 = vld [vmem:[%s2961_s6] sm:$0xff]  }
 0x874   : > { %2086 = vmatprep.mubr.msk.bf16.mxu0 %vm2527_vm2, %v2526_v9  ;;  %2085 = vmatpush3.bf16.msra.mxu0 %v1424_v8 }
 0x875   : > { %2098 = vmatprep.subr.bf16.mxu0 %v2526_v9 }
 0x93e   : > { %v1250_v54 = vpop.f32.mrb[12].mxu0 }
 0x93f   : > { %v1256_v55 = vpack.c.bf16 %v1250_v54, %v1250_v54  ;;  %v2064_v56 = vpop.f32.mrb[13].mxu0  ;;  %v2247_v54 = vld [vmem:[%s2961_s6 + $0x18] sm:$0xff]  }
 0x940   : > { %v1253_v57 = vpop.f32.mrb[14].mxu0 }
 0x941   : > { %v2065_v58 = vpop.f32.mrb[15].mxu0  ;;  %2069 = vmatmul.mubr.msk.bf16.vlgmr.msra.gmra.mrb[20].mxu1 %vm828_vm3, %v1256_v55  ;;  %v1957_v55 = vld [vmem:[%s3301_s14] ss:$0 sm:$0xff] }
 0x942   : > { %2080 = vmatprep.mubr.msk.bf16.mxu1 %vm2527_vm2, %v2526_v9 }
 0x946   : > { %v1350_v59 = vpop.f32.mrb[16].mxu0 }
 0x947   : > { %v1356_v60 = vmul.f32 0.35355338, %v1350_v59  ;;  %v2076_v61 = vpop.f32.mrb[17].mxu0 }
 0x948   : > { %v1353_v62 = vpop.f32.mrb[18].mxu0 }
 0x949   : > { %v2077_v63 = vpop.f32.mrb[19].mxu0  ;;  %v1357_v0 = vsel %vm828_vm3, %v1356_v60, -inf }
 0x94a   : > { %1358 = vmax.xlane.f32.xlu1 %v1357_v0 }
 0x9d7   : > { %v1359_v2 = vpop.xlane.xlu1 %1358 }
 0x9d8   : > { %v1360_v3 = vsub.f32 %v1356_v60, %v1359_v2 }
 0x9da   : > { %v1361_v4 = vmul.f32 1.442695, %v1360_v3 }
 0x9dc   : > { %2262 = vpow2.f32 %v1361_v4 }
 0x9e6   : > { %v2263_v5 = vpop.eup %2262 }
 0x9e7   : > { %v1363_v6 = vsel %vm828_vm3, %v2263_v5, 0.0 }
 0x9e8   : > { %1364 = vadd.xlane.f32.xlu0 %v1363_v6 }
 0x9fe   : > { %1369 = vrot.lane.b32.xlu0 %v3002_v26, %s2538_s4 }
 0xa14   : > { %v1299_v10 = vpop.f32.mrb[20].mxu1 }
 0xa15   : > { %v1305_v11 = vadd.f32 %v1299_v10, %v3053_v28  ;;  %v2070_v12 = vpop.f32.mrb[21].mxu1 }
 0xa16   : > { %v1302_v13 = vpop.f32.mrb[22].mxu1 }
 0xa17   : > { %v2071_v14 = vpop.f32.mrb[23].mxu1 }
 0xa75   : > { %v1365_v15 = vpop.xlane.xlu0 %1364 }
 0xa76   : > { %2264 = vrcp.f32 %v1365_v15 }
 0xa79   : > { %v1370_v16 = vpop.permute.xlu0 %1369 }
 0xa7a   : > { %v1375_v17 = vsel %vm893_vm4, %v1370_v16, 0 }
 0xa7b   : > { %2079 = vmatpush3.bf16.msra.mxu1 %v1375_v17 }
 0xa7c   : > { %2090 = vmatprep.subr.bf16.mxu1 %v2526_v9 }
 0xa80   : > { %v2265_v26 = vpop.eup %2264 }
 0xa81   : > { %v1367_v18 = vmul.f32 %v2265_v26, %v2263_v5 }
 0xa83   : > { %v1368_v19 = vpack.c.bf16 %v1367_v18, %v1367_v18 }
 0xa85   : > { %2081 = vmatmul.mubr.msk.bf16.vlgmr.msra.gmra.mrb[24].mxu1 %vm828_vm3, %v1368_v19 }
 0xa86   : > { %2094 = vmatprep.mubr.msk.bf16.mxu1 %vm2527_vm2, %v2526_v9  ;;  %2091 = vmatpush3.bf16.msra.mxu1 %v2242_v40 }
 0xa87   : > { %2092 = vmatprep.subr.bf16.mxu1 %v2526_v9 }
 0xa8a   : > { %2093 = vmatpush3.bf16.msra.mxu1 %v2243_v41 }
 0xb58   : > { %v1411_v20 = vpop.f32.mrb[24].mxu1 }
 0xb59   : > { %v1417_v21 = vpack.c.bf16 %v1411_v20, %v1411_v20  ;;  %v2082_v22 = vpop.f32.mrb[25].mxu1 }
 0xb5a   : > { %v1414_v23 = vpop.f32.mrb[26].mxu1 }
 0xb5b   : > { %v2083_v24 = vpop.f32.mrb[27].mxu1  ;;  %2087 = vmatmul.mubr.msk.bf16.vlgmr.msra.gmra.mrb[20].mxu0 %vm828_vm3, %v1417_v21 }
 0xb5c   : > { %2106 = vmatprep.mubr.msk.bf16.mxu0 %vm2527_vm2, %v2526_v9  ;;  %2099 = vmatpush3.bf16.msra.mxu0 %v2244_v51 }
 0xb5d   : > { %2100 = vmatprep.subr.bf16.mxu0 %v2526_v9 }
 0xb60   : > { %2101 = vmatpush3.bf16.msra.mxu0 %v2245_v52 }
 0xb61   : > { %2102 = vmatprep.subr.bf16.mxu0 %v2526_v9 }
 0xb64   : > { %2103 = vmatpush3.bf16.msra.mxu0 %v2246_v53 }
 0xb65   : > { %2104 = vmatprep.subr.bf16.mxu0 %v2526_v9 }
 0xb68   : > { %2105 = vmatpush3.bf16.msra.mxu0 %v2247_v54 }
 0xc2e   : > { %v1460_v25 = vpop.f32.mrb[20].mxu0 }
 0xc2f   : > { %v1466_v28 = vadd.f32 %v1460_v25, %v1305_v11  ;;  %v2088_v29 = vpop.f32.mrb[21].mxu0 }
 0xc30   : > { %v1463_v30 = vpop.f32.mrb[22].mxu0 }
 0xc31   : > { %v1474_v31 = vadd.f32 %v1954_v27, %v1466_v28  ;;  %v2089_v32 = vpop.f32.mrb[23].mxu0 }
 0xc33   : > { %v3097_v33 = vadd.f32 %v1474_v31, %v2970_v1 }
 0xc35   : > { %v1478_v34 = vsel %vm728_vm1, %v3097_v33, 0.0 }
 0xc36   : > { %1479 = vadd.xlane.f32.xlu1 %v1478_v34 }
 0xcc3   : > { %v1480_v35 = vpop.xlane.xlu1 %1479 }
 0xcc4   : > { %v1481_v36 = vmul.f32 0.03125, %v1480_v35 }
 0xcc6   : > { %v1482_v37 = vsub.f32 %v3097_v33, %v1481_v36 }
 0xcc8   : > { %v1483_v38 = vmul.f32 %v1482_v37, %v1482_v37 }
 0xcca   : > { %v1484_v39 = vsel %vm728_vm1, %v1483_v38, 0.0 }
 0xccb   : > { %1485 = vadd.xlane.f32.xlu1 %v1484_v39 }
 0xd58   : > { %v1486_v1 = vpop.xlane.xlu1 %1485 }
 0xd59   : > { %v1487_v42 = vmul.f32 0.03125, %v1486_v1 }
 0xd5b   : > { %v1488_v43 = vadd.f32 1e-05, %v1487_v42 }
 0xd5d   : > { %2266 = vrsqrt.f32 %v1488_v43 }
 0xd67   : > { %v2267_v44 = vpop.eup %2266 }
 0xd68   : > { %v1490_v46 = vmul.f32 %v2267_v44, %v1482_v37 }
 0xd6a   : > { %v1497_v48 = vmul.f32 %v1955_v45, %v1490_v46 }
 0xd6c   : > { %v1504_v49 = vadd.f32 %v1956_v47, %v1497_v48 }
 0xd6e   : > { %v1505_v50 = vpack.c.bf16 %v1504_v49, %v1504_v49 }
 0xd70   : > { %2095 = vmatmul.mubr.msk.bf16.vlgmr.msra.gmra.mrb[28].mxu1 %vm728_vm1, %v1505_v50 }
 0xe43   : > { %v1566_v56 = vpop.f32.mrb[28].mxu1 }
 0xe44   : > { %v1567_v57 = vadd.f32 %v1957_v55, %v1566_v56  ;;  %v2096_v58 = vpop.f32.mrb[29].mxu1 }
 0xe45   : > { %v1569_v59 = vpop.f32.mrb[30].mxu1 }
 0xe46   : > { %v1573_v60 = vmul.f32 0.044715, %v1567_v57  ;;  %v2097_v61 = vpop.f32.mrb[31].mxu1  ;;  %v1572_v4 = vmul.f32 0.5, %v1567_v57 }
 0xe48   : > { %v1574_v62 = vmul.f32 %v1573_v60, %v1567_v57 }
 0xe4a   : > { %v1575_v63 = vmul.f32 %v1574_v62, %v1567_v57 }
 0xe4c   : > { %v1576_v0 = vadd.f32 %v1575_v63, %v1567_v57 }
 0xe4e   : > { %v1577_v2 = vmul.f32 0.7978846, %v1576_v0 }
 0xe50   : > { %2268 = vtanh.f32 %v1577_v2 }
 0xe5a   : > { %v2269_v3 = vpop.eup %2268 }
 0xe5b   : > { %v1579_v9 = vadd.f32 1.0, %v2269_v3 }
 0xe5d   : > { %v1580_v5 = vmul.f32 %v1579_v9, %v1572_v4 }
 0xe5f   : > { %v1581_v6 = vpack.c.bf16 %v1580_v5, %v1580_v5 }
 0xe61   : > { %2107 = vmatmul.mubr.msk.bf16.vlgmr.msra.gmra.mrb[24].mxu0 %vm1621_vm5, %v1581_v6 }
 0xf34   : > { %v1659_v8 = vpop.f32.mrb[24].mxu0 }
 0xf35   : > { %v1660_v10 = vadd.f32 %v1961_v7, %v1659_v8  ;;  %v2108_v11 = vpop.f32.mrb[25].mxu0 }
 0xf36   : > { %v1662_v12 = vpop.f32.mrb[26].mxu0 }
 0xf37   : > { %v1665_v13 = vadd.f32 %v1660_v10, %v3097_v33  ;;  %v2109_v14 = vpop.f32.mrb[27].mxu0 }
 0xf39   : > { %1666 = vst.msk [vmem:[%s2965_s25] sm:$0xff] %vm728_vm1, %v1665_v13 }
 0xf3a   : > { %2403 = shalt.err (!%p2400_p3)
}
 0xf3b   : > { %s2404_s9 = scalar_lea.hbm %s3131_s20, 128  ;;  %s2408_s30 = scalar_lea.hbm %s3304_s22, 256 }
 0xf3c   : > { %p2405_p11 = scmp.ne.s32.totalorder %s3131_s20, %s2404_s9  ;;  %p2409_p9 = scmp.lt.u32.totalorder %s3131_s20, %s3304_s22 }
 0xf3d   : > { %p2410_p10 = scmp.lt.u32.totalorder %s2408_s30, %s2404_s9  ;;  %p2412_p7 = scmp.lt.u32.totalorder %s2404_s9, %s3131_s20 }
 0xf3e   : > { %p2406_p8 = pnand %p2405_p11, %p3305_p12 }
 0xf3f   : > { %p2411_p1 = por %p2410_p10, %p2409_p9 }
 0xf40   : > { %p2407_p13 = pneg %p2406_p8 }
 0xf41   : > { %p2413_p6 = por %p2412_p7, %p2411_p1 }
 0xf43   : > { %p2414_p0 = pnand %p2413_p6, %p2407_p13 }
 0xf45   : > { %2417 = shalt.err (!%p2414_p0)
}
 0xf46   : > { %2118 = dma.vmem_to_hbm [thread:$0]  (%p3305_p12), %s3133_s11, 128, %s3131_s20, %s1668_s13  }
 0xf47 PF: > { %s3306_s0 = sld [smem:[#allocation16_spill]]  ;;  %p2138_p2 = scmp.ge.s32.totalorder %s2520_s18, 2 }
 0xf48   : > { %p3307_p4 = scmp.ne.s32.totalorder %s3269_s3, 0 }
 0xf4a   : > { %p2134_p5 = pnand %p2138_p2, %p3307_p4 }
 0xf4d   : > { %s1693_s16 = sand.u32 1, %s3306_s0  }
 0xf4e   : > { %s1694_s27 = scalar_lea.sflag [#allocation4], %s1693_s16 }
 0xf4f   : > { %2475 = dma.done.wait (!%p2134_p5), %s1694_s27, 128  }
 0xf50   : > { %2477 = vsyncadd (!%p2134_p5), %s1694_s27, 4294967168  ;;  %s35_s18 = sadd.s32 1, %s2520_s18   ;;  %s3308_s10 = sld [smem:[#allocation15_spill]] }
 0xf51   : > { %p32_p3 = scmp.ge.s32.totalorder %s35_s18, 6   ;;  %s3309_s27 = sld [smem:[#allocation24_spill]] }
 0xf52   : > { %s3310_s28 = sld [smem:[#allocation17_spill]]  ;;  %s3311_s29 = sld [smem:[#allocation18_spill]] }
 0xf53   : > { %s3312_s30 = sld [smem:[#allocation26_spill]]  ;;  %s3313_s14 = sld [smem:[#allocation21_spill]] }
 0xf54   : > { %s3314_s15 = sld [smem:[#allocation22_spill]]  ;;  %s3315_s16 = sld [smem:[#allocation23_spill]] }
 0xf55   : > { %s3316_s17 = sld [smem:[#allocation25_spill]]  ;;  %s3317_s25 = smov %s2484_s26 }
 0xf56   : > { %s3318_s26 = smov %s3308_s10  ;;  %34 = sbr.rel (!%p32_p3) target bundleno = 28 (0x1c), region = 188 }
 0xf5d   :  { %1699 = vsyncpa [#allocation3], 1 }
 0xf5e   :  { %1701 = vsyncpa [#allocation3 + $0x1], 1 }
 0xf5f   :  { %1702 = vsyncpa [#allocation6], 1 }
 0xf60   :  { %1704 = vsyncpa [#allocation6 + $0x1], 1 }
 0xf61   :  { %1705 = vsyncpa [#allocation9], 1 }
 0xf62   :  { %1707 = vsyncpa [#allocation9 + $0x1], 1 }
 0xf63   :  { %1708 = vsyncpa [#allocation4], 1 }
 0xf64   :  { %1710 = vsyncpa [#allocation4 + $0x1], 1 }

</bundles_post_ra>
